<compile_context>
chip_gen: v7x
topology: tpu7x:2x2x1
jax: 0.10.0
libtpu: 0.0.40
codegen_flags: <defaults>
</compile_context>

<pallas_src>
import functools

import jax
import jax.numpy as jnp
import numpy as np
from jax import lax
from jax.experimental import pallas as pl
from jax.experimental.pallas import tpu as pltpu

# wme slab row-block indices: six HxH matrices per layer
_W_EA, _W_E1, _W_A0, _W_C0, _W_N0A, _W_N1 = range(6)
_N_WME = 6
# rv slab row indices: twelve [1,H] row vectors per layer (+ pad rows)
(_R_WR, _R_BE0, _R_BE1, _R_BA0, _R_WA1, _R_BC0, _R_WC1,
 _R_BN0, _R_BN1, _R_G, _R_B, _R_BA1) = range(12)
_RV_ROWS = 16


def silu(v):
    return v * jax.nn.sigmoid(v)


def _round_up(a, b):
    return -(-a // b) * b


# ------------------------------ fused kernel --------------------------------

def _egnn_kernel(h0_ref, x0_ref, icnt_ref, gr_ref, gc_ref, ea_ref,
                 wi_ref, bi_ref, wo_ref, bo_ref, wmn_ref, wme_ref, rv_ref,
                 out_ref,
                 h_s, x_s, srcr_s, srcc_s, n0h_s, agg_s):
    f32, bf16 = jnp.float32, jnp.bfloat16
    H = h_s.shape[1]
    l = pl.program_id(0)        # layer
    k = pl.program_id(1)        # edge block

    def dot(a, b):
        return jnp.dot(a, b, preferred_element_type=f32)

    def W(i):                   # read an HxH matrix straight off the layer block
        return wme_ref[0, i * H:(i + 1) * H, :]

    def R(i):                   # [1, H] row vector
        return rv_ref[0, i:i + 1, :]

    # ---- per-layer setup (first edge block of every layer) ------------------
    @pl.when(k == 0)
    def _setup():
        @pl.when(l == 0)
        def _embed():
            h_s[...] = dot(h0_ref[...], wi_ref[...]) + bi_ref[...]
            x_s[...] = x0_ref[...]

        # single [N,H]x[H,3H] MXU pass: [h@W_HR | h@W_HC | h@W_N0H]
        proj = dot(h_s[...], wmn_ref[0])
        xb = x_s[...]
        srcr_s[...] = jnp.concatenate([proj[:, :H], xb], axis=1).astype(bf16)
        srcc_s[...] = jnp.concatenate([proj[:, H:2 * H], xb], axis=1).astype(bf16)
        n0h_s[...] = proj[:, 2 * H:]
        agg_s[...] = jnp.zeros_like(agg_s)

    # ---- edge-block compute (every grid step) --------------------------------
    gr = gr_ref[...]                                  # [TE, N] bf16 one-hot (row)
    gc = gc_ref[...]                                  # [TE, N] bf16 one-hot (col)
    # fused gathers: h-projection and x ride the same MXU pass
    er = dot(gr, srcr_s[...])                         # [TE, H+3] == [h@W_HR | x][row]
    ec = dot(gc, srcc_s[...])                         # [TE, H+3] == [h@W_HC | x][col]
    hr, cr = er[:, :H], er[:, H:]
    hc, cc = ec[:, :H], ec[:, H:]

    # coord2radial (normalize=True); padded edges give diff == 0 -> trans == 0
    diff = cr - cc
    radial = jnp.sum(diff * diff, axis=1, keepdims=True)
    inv_norm = pl.reciprocal(jnp.sqrt(radial) + 1e-8, approx=True)   # EUP slot
    diff_n = diff * inv_norm

    # edge MLP: concat([h_row, h_col, radial, edge_attr]) as split matmuls (f32)
    z = hr + hc + radial * R(_R_WR) + dot(ea_ref[...], W(_W_EA)) + R(_R_BE0)
    m = silu(dot(silu(z), W(_W_E1)) + R(_R_BE1))

    # attention; 1-wide final projection as VPU mul + lane reduce
    a = silu(dot(m, W(_W_A0)) + R(_R_BA0))
    att = jax.nn.sigmoid(jnp.sum(a * R(_R_WA1), axis=1, keepdims=True)
                         + rv_ref[0, _R_BA1:_R_BA1 + 1, 0:1])
    ef = m * att

    # coord MLP; 1-wide projection as VPU mul + lane reduce
    c = silu(dot(ef, W(_W_C0)) + R(_R_BC0))
    trans = diff_n * jnp.sum(c * R(_R_WC1), axis=1, keepdims=True)

    # fused scatter: segment_sum of [ef | trans] in ONE transposed-LHS MXU pass
    # (out-of-range / padded edges have all-zero one-hot rows -> silently dropped;
    #  torch scatter_add_ would error instead)
    eout = jnp.concatenate([ef, trans], axis=1).astype(bf16)          # [TE, H+3]
    agg_s[...] += lax.dot_general(gr, eout, (((0,), (0,)), ((), ())),
                                  preferred_element_type=f32)          # [N, H+3]

    # ---- per-layer finalize (last edge block) --------------------------------
    @pl.when(k == pl.num_programs(1) - 1)
    def _finalize():
        agg = agg_s[...]
        h = h_s[...]
        # coords_agg='mean' with exact inverse counts
        x_s[...] = x_s[...] + agg[:, H:] * icnt_ref[...]
        # node MLP + residual + LayerNorm (h@W_N0H was precomputed at k==0)
        zz = silu(n0h_s[...] + dot(agg[:, :H], W(_W_N0A)) + R(_R_BN0))
        out = h + dot(zz, W(_W_N1)) + R(_R_BN1)
        mu = jnp.mean(out, axis=1, keepdims=True)
        var = jnp.mean((out - mu) ** 2, axis=1, keepdims=True)
        h_s[...] = (out - mu) * lax.rsqrt(var + 1e-5) * R(_R_G) + R(_R_B)

        @pl.when(l == pl.num_programs(0) - 1)
        def _emit():
            # output embedding + lane-dense packed store [h_out | x | 0-pad]
            h_out = dot(h_s[...], wo_ref[...]) + bo_ref[...]
            pad = out_ref.shape[1] - h_out.shape[1] - 3
            out_ref[...] = jnp.concatenate(
                [h_out, x_s[...], jnp.zeros((h_out.shape[0], pad), f32)], axis=1)


# ----------------------------- parameter init --------------------------------

def _init_linear(key, din, dout):
    kw, kb = jax.random.split(key)
    lim = 1.0 / np.sqrt(din)
    w = jax.random.uniform(kw, (din, dout), jnp.float32, -lim, lim)
    b = jax.random.uniform(kb, (1, dout), jnp.float32, -lim, lim)
    return w, b


def _init_layer(key, hidden, edge_nf):
    keys = jax.random.split(key, 8)
    lp = {}
    edge_in = 2 * hidden + 1 + edge_nf
    w0, b0 = _init_linear(keys[0], edge_in, hidden)
    lp['we_hr'] = w0[:hidden]
    lp['we_hc'] = w0[hidden:2 * hidden]
    lp['we_r'] = w0[2 * hidden:2 * hidden + 1]
    lp['we_ea'] = w0[2 * hidden + 1:]
    lp['be0'] = b0
    lp['we1'], lp['be1'] = _init_linear(keys[1], hidden, hidden)
    wn0, lp['bn0'] = _init_linear(keys[2], 2 * hidden, hidden)
    lp['wn0_h'] = wn0[:hidden]
    lp['wn0_a'] = wn0[hidden:]
    lp['wn1'], lp['bn1'] = _init_linear(keys[3], hidden, hidden)
    lp['wa0'], lp['ba0'] = _init_linear(keys[4], hidden, hidden // 2)
    lp['wa1'], lp['ba1'] = _init_linear(keys[5], hidden // 2, 1)
    lp['wc0'], lp['bc0'] = _init_linear(keys[6], hidden, hidden)
    # xavier_uniform(gain=0.001), no bias  (matches torch EGNN init)
    bound = 0.001 * np.sqrt(6.0 / (hidden + 1))
    lp['wc1'] = jax.random.uniform(keys[7], (hidden, 1), jnp.float32, -bound, bound)
    lp['gamma'] = jnp.ones((1, hidden), jnp.float32)
    lp['beta'] = jnp.zeros((1, hidden), jnp.float32)
    return lp


def init_egnn_params(key, in_nf, hidden, out_nf, edge_nf, n_layers):
    params = {}
    key, k = jax.random.split(key)
    params['emb_in'] = _init_linear(k, in_nf, hidden)
    key, k = jax.random.split(key)
    params['emb_out'] = _init_linear(k, hidden, out_nf)
    layers = []
    for _ in range(n_layers):
        key, k = jax.random.split(key)
        layers.append(_init_layer(k, hidden, edge_nf))
    params['layers'] = layers
    return params


# ------------------------------ weight packing -------------------------------

def pack_params(params, hidden, edge_nf):
    """wmn [L, H, 3H] (node-side packed), wme [L, 6H, H], rv [L, 16, H]."""
    H = hidden
    wmn_list, wme_list, rv_list = [], [], []
    for lp in params['layers']:
        wmn_list.append(jnp.concatenate(
            [lp['we_hr'], lp['we_hc'], lp['wn0_h']], axis=1))             # [H, 3H]

        we_ea_pad = jnp.zeros((H, H), jnp.float32).at[:edge_nf].set(lp['we_ea'])
        wa0_pad = jnp.zeros((H, H), jnp.float32).at[:, :H // 2].set(lp['wa0'])
        wme_list.append(jnp.concatenate(
            [we_ea_pad, lp['we1'], wa0_pad, lp['wc0'], lp['wn0_a'], lp['wn1']],
            axis=0))                                                       # [6H, H]

        ba0_pad = jnp.zeros((1, H), jnp.float32).at[:, :H // 2].set(lp['ba0'])
        wa1_pad = jnp.zeros((1, H), jnp.float32).at[:, :H // 2].set(lp['wa1'].T)
        rows = [lp['we_r'], lp['be0'], lp['be1'], ba0_pad, wa1_pad,
                lp['bc0'], lp['wc1'].T, lp['bn0'], lp['bn1'],
                lp['gamma'], lp['beta'],
                jnp.broadcast_to(lp['ba1'], (1, H))]
        rv_list.append(jnp.concatenate(
            rows + [jnp.zeros((_RV_ROWS - len(rows), H), jnp.float32)], axis=0))
    return jnp.stack(wmn_list), jnp.stack(wme_list), jnp.stack(rv_list)


def _vmem_budget(N, F_in, H, out_nf, TE):
    f4, b2 = 4, 2
    tiled = 2 * (2 * TE * N * b2 + TE * H * f4)                        # gr, gc, ea x2 bufs
    per_layer = 2 * (3 * H * H + _N_WME * H * H + _RV_ROWS * H) * f4   # weight slabs x2 bufs
    fixed = (N * F_in + N * 3 + N + F_in * H + H + H * out_nf + out_nf + N * 128) * f4
    scratch = (2 * N * H + N * 3 + N * (H + 3)) * f4 + 2 * N * (H + 3) * b2
    return int(min(max(tiled + per_layer + fixed + scratch + (4 << 20), 16 << 20),
                   96 << 20))


# ------------------------------ EGNN forward ---------------------------------

def egnn_forward(params, h, x, row, col, edge_attr, coord_scale=1.0, edge_tile=256):
    N, F_in = h.shape
    H = params['emb_in'][0].shape[1]
    out_nf = params['emb_out'][0].shape[1]
    fe = edge_attr.shape[1]
    L = len(params['layers'])
    E = row.shape[0]
    assert out_nf + 3 <= 128, "packed output assumes out_nf + 3 <= 128"
    assert fe <= H and H % 8 == 0

    if coord_scale != 1.0:
        x = x * coord_scale

    TE = min(_round_up(edge_tile, 8), _round_up(E, 8))
    KE = -(-E // TE)
    E_pad = KE * TE

    # ---- graph-structure preprocessing (pure JAX glue) ----
    pad_idx = jnp.full((E_pad - E,), N, dtype=row.dtype)   # index==N -> all-zero one-hot
    row_p = jnp.concatenate([row, pad_idx])
    col_p = jnp.concatenate([col, pad_idx])
    g_row = jax.nn.one_hot(row_p, N, dtype=jnp.bfloat16)   # [E_pad, N], exact in bf16
    g_col = jax.nn.one_hot(col_p, N, dtype=jnp.bfloat16)
    ea_pad = jnp.zeros((E_pad, H), jnp.float32).at[:E, :fe].set(edge_attr)
    cnt = jnp.maximum(
        jax.ops.segment_sum(jnp.ones((E,), jnp.float32), row, num_segments=N), 1.0)
    inv_cnt = (1.0 / cnt).reshape(N, 1)                    # exact segment-mean scale

    wmn, wme, rv = pack_params(params, H, fe)

    cmap = lambda l, k: (0, 0)
    emap = lambda l, k: (k, 0)
    lmap = lambda l, k: (l, 0, 0)

    cost = pl.CostEstimate(
        flops=int(L * (6 * E_pad * N * (H + 3) + 8 * E_pad * H * H
                       + 2 * N * H * 5 * H)),
        transcendentals=int(L * E_pad * (3 * H + H // 2 + 3)),
        bytes_accessed=int(L * (2 * E_pad * N * 2 + E_pad * H * 4)
                           + L * (3 * H * H + _N_WME * H * H + _RV_ROWS * H) * 4
                           + (N * F_in + N * 3 + N + F_in * H + H
                              + H * out_nf + out_nf + N * 128) * 4))

    packed = pl.pallas_call(
        _egnn_kernel,
        out_shape=jax.ShapeDtypeStruct((N, 128), jnp.float32),
        grid_spec=pltpu.PrefetchScalarGridSpec(
            num_scalar_prefetch=0,
            grid=(L, KE),
            in_specs=[
                pl.BlockSpec((N, F_in), cmap),                 # h0
                pl.BlockSpec((N, 3), cmap),                    # x0
                pl.BlockSpec((N, 1), cmap),                    # inv_cnt
                pl.BlockSpec((TE, N), emap),                   # g_row block (bf16)
                pl.BlockSpec((TE, N), emap),                   # g_col block (bf16)
                pl.BlockSpec((TE, H), emap),                   # edge_attr block
                pl.BlockSpec((F_in, H), cmap),                 # W_in
                pl.BlockSpec((1, H), cmap),                    # b_in
                pl.BlockSpec((H, out_nf), cmap),               # W_out
                pl.BlockSpec((1, out_nf), cmap),               # b_out
                pl.BlockSpec((1, H, 3 * H), lmap),             # wmn (per-layer)
                pl.BlockSpec((1, _N_WME * H, H), lmap),        # wme (per-layer)
                pl.BlockSpec((1, _RV_ROWS, H), lmap),          # rv  (per-layer)
            ],
            out_specs=pl.BlockSpec((N, 128), cmap),
            scratch_shapes=[
                pltpu.VMEM((N, H), jnp.float32),               # h (persists across grid)
                pltpu.VMEM((N, 3), jnp.float32),               # x
                pltpu.VMEM((N, H + 3), jnp.bfloat16),          # gather source (row side)
                pltpu.VMEM((N, H + 3), jnp.bfloat16),          # gather source (col side)
                pltpu.VMEM((N, H), jnp.float32),               # h @ W_N0H
                pltpu.VMEM((N, H + 3), jnp.float32),           # [agg_h | agg_x] accumulator
            ]),
        compiler_params=pltpu.CompilerParams(
            dimension_semantics=("arbitrary", "arbitrary"),
            vmem_limit_bytes=_vmem_budget(N, F_in, H, out_nf, TE)),
        cost_estimate=cost,
    )(h, x, inv_cnt, g_row, g_col, ea_pad,
      params['emb_in'][0], params['emb_in'][1],
      params['emb_out'][0], params['emb_out'][1], wmn, wme, rv)

    h_out = packed[:, :out_nf]
    x_out = packed[:, out_nf:out_nf + 3]
    if coord_scale != 1.0:
        x_out = x_out / coord_scale
    return h_out, x_out


# ------------------------- pure-JAX reference (check) ------------------------

def ref_forward(params, h, x, row, col, edge_attr):
    dot = functools.partial(jnp.dot, precision=jax.lax.Precision.HIGHEST)
    h = dot(h, params['emb_in'][0]) + params['emb_in'][1]
    N = h.shape[0]
    E = row.shape[0]
    for lp in params['layers']:
        diff = x[row] - x[col]
        radial = jnp.sum(diff ** 2, axis=1, keepdims=True)
        diffn = diff / (jnp.sqrt(radial) + 1e-8)
        z = (dot(h[row], lp['we_hr']) + dot(h[col], lp['we_hc'])
             + radial * lp['we_r'] + dot(edge_attr, lp['we_ea']) + lp['be0'])
        z = silu(z)
        m = silu(dot(z, lp['we1']) + lp['be1'])
        a = silu(dot(m, lp['wa0']) + lp['ba0'])
        att = jax.nn.sigmoid(dot(a, lp['wa1']) + lp['ba1'])
        ef = m * att
        c = silu(dot(ef, lp['wc0']) + lp['bc0'])
        trans = diffn * dot(c, lp['wc1'])
        ssum = jax.ops.segment_sum(trans, row, num_segments=N)
        cnt = jnp.maximum(
            jax.ops.segment_sum(jnp.ones((E, 1), jnp.float32), row,
                                num_segments=N), 1.0)
        x = x + ssum / cnt
        agg = jax.ops.segment_sum(ef, row, num_segments=N)
        zz = silu(dot(h, lp['wn0_h']) + dot(agg, lp['wn0_a']) + lp['bn0'])
        out = h + dot(zz, lp['wn1']) + lp['bn1']
        mu = jnp.mean(out, axis=1, keepdims=True)
        var = jnp.mean((out - mu) ** 2, axis=1, keepdims=True)
        h = (out - mu) * jax.lax.rsqrt(var + 1e-5) * lp['gamma'] + lp['beta']
    h = dot(h, params['emb_out'][0]) + params['emb_out'][1]
    return h, x


# ----------------------------------- main ------------------------------------

if __name__ == "__main__":
    N, IN_NF, HID, OUT_NF, EDGE_NF, N_LAYERS = 8, 8, 32, 8, 2, 2

    # fully-connected edge list without self loops
    rows, cols = [], []
    for i in range(N):
        for j in range(N):
            if i != j:
                rows.append(i)
                cols.append(j)
    row = jnp.array(rows, dtype=jnp.int32)
    col = jnp.array(cols, dtype=jnp.int32)

    key = jax.random.PRNGKey(0)
    kh, kx, ke, kp = jax.random.split(key, 4)
    h_in = jax.random.normal(kh, (N, IN_NF), jnp.float32)
    x_in = jax.random.normal(kx, (N, 3), jnp.float32)
    edge_attr = jax.random.normal(ke, (row.shape[0], EDGE_NF), jnp.float32)
    params = init_egnn_params(kp, IN_NF, HID, OUT_NF, EDGE_NF, N_LAYERS)

    # edge_tile=32 -> E=56 padded to 64, 2 edge blocks: exercises the pipeline.
    fwd = jax.jit(lambda p, h, x, ea:
                  egnn_forward(p, h, x, row, col, ea, edge_tile=32))
    h_out, x_out = fwd(params, h_in, x_in, edge_attr)
    jax.block_until_ready((h_out, x_out))

    h_ref, x_ref = ref_forward(params, h_in, x_in, row, col, edge_attr)

    assert h_out.shape == (N, OUT_NF) and x_out.shape == (N, 3)
    # bf16 gather/scatter operands (f32 accumulation) vs HIGHEST-precision f32
    # reference: observed error ~1e-2 on h, ~1e-5 on x.
    assert np.allclose(np.asarray(h_out), np.asarray(h_ref), atol=5e-2, rtol=5e-2)
    assert np.allclose(np.asarray(x_out), np.asarray(x_ref), atol=2e-2, rtol=2e-2)
    print("KERNEL_OK")
</pallas_src>

<mosaic_0001>
module attributes {stable_mosaic.version = 11 : i64} {
  func.func @_egnn_kernel(%arg0: i32, %arg1: i32, %arg2: memref<8x8xf32, #tpu.memory_space<vmem>>, %arg3: memref<8x3xf32, #tpu.memory_space<vmem>>, %arg4: memref<8x1xf32, #tpu.memory_space<vmem>>, %arg5: memref<32x8xbf16, #tpu.memory_space<vmem>>, %arg6: memref<32x8xbf16, #tpu.memory_space<vmem>>, %arg7: memref<32x32xf32, #tpu.memory_space<vmem>>, %arg8: memref<8x32xf32, #tpu.memory_space<vmem>>, %arg9: memref<1x32xf32, #tpu.memory_space<vmem>>, %arg10: memref<32x8xf32, #tpu.memory_space<vmem>>, %arg11: memref<1x8xf32, #tpu.memory_space<vmem>>, %arg12: memref<1x32x96xf32, #tpu.memory_space<vmem>>, %arg13: memref<1x192x32xf32, #tpu.memory_space<vmem>>, %arg14: memref<1x16x32xf32, #tpu.memory_space<vmem>>, %arg15: memref<8x128xf32, #tpu.memory_space<vmem>>, %arg16: memref<8x32xf32, #tpu.memory_space<vmem>>, %arg17: memref<8x3xf32, #tpu.memory_space<vmem>>, %arg18: memref<8x35xbf16, #tpu.memory_space<vmem>>, %arg19: memref<8x35xbf16, #tpu.memory_space<vmem>>, %arg20: memref<8x32xf32, #tpu.memory_space<vmem>>, %arg21: memref<8x35xf32, #tpu.memory_space<vmem>>) attributes {dimension_semantics = [#tpu.dimension_semantics<arbitrary>, #tpu.dimension_semantics<arbitrary>], iteration_bounds = array<i64: 2, 2>, scalar_prefetch = 0 : i64, scratch_operands = 6 : i64, tpu.core_type = #tpu.core_type<tc>, window_params = [{pipeline_mode = #tpu.pipeline_mode<synchronous>, transform_indices = @transform_0, window_bounds = array<i64: 8, 8>}, {pipeline_mode = #tpu.pipeline_mode<synchronous>, transform_indices = @transform_1, window_bounds = array<i64: 8, 3>}, {pipeline_mode = #tpu.pipeline_mode<synchronous>, transform_indices = @transform_2, window_bounds = array<i64: 8, 1>}, {transform_indices = @transform_3, window_bounds = array<i64: 32, 8>}, {transform_indices = @transform_4, window_bounds = array<i64: 32, 8>}, {transform_indices = @transform_5, window_bounds = array<i64: 32, 32>}, {pipeline_mode = #tpu.pipeline_mode<synchronous>, transform_indices = @transform_6, window_bounds = array<i64: 8, 32>}, {pipeline_mode = #tpu.pipeline_mode<synchronous>, transform_indices = @transform_7, window_bounds = array<i64: 1, 32>}, {pipeline_mode = #tpu.pipeline_mode<synchronous>, transform_indices = @transform_8, window_bounds = array<i64: 32, 8>}, {pipeline_mode = #tpu.pipeline_mode<synchronous>, transform_indices = @transform_9, window_bounds = array<i64: 1, 8>}, {transform_indices = @transform_10, window_bounds = array<i64: 1, 32, 96>}, {transform_indices = @transform_11, window_bounds = array<i64: 1, 192, 32>}, {transform_indices = @transform_12, window_bounds = array<i64: 1, 16, 32>}, {pipeline_mode = #tpu.pipeline_mode<synchronous>, transform_indices = @transform_13, window_bounds = array<i64: 8, 128>}]} {
    %c0_i32 = arith.constant 0 : i32
    %0 = arith.cmpi eq, %arg1, %c0_i32 : i32
    %1 = arith.extui %0 : i1 to i32
    %c0_i32_0 = arith.constant 0 : i32
    %2 = arith.cmpi ne, %1, %c0_i32_0 : i32
    scf.if %2 {
      %c0_i32_56 = arith.constant 0 : i32
      %118 = arith.cmpi eq, %arg0, %c0_i32_56 : i32
      %119 = arith.extui %118 : i1 to i32
      %c0_i32_57 = arith.constant 0 : i32
      %120 = arith.cmpi ne, %119, %c0_i32_57 : i32
      scf.if %120 {
        %c0_75 = arith.constant 0 : index
        %c0_76 = arith.constant 0 : index
        %138 = vector.load %arg2[%c0_75, %c0_76] : memref<8x8xf32, #tpu.memory_space<vmem>>, vector<8x8xf32>
        %c0_77 = arith.constant 0 : index
        %c0_78 = arith.constant 0 : index
        %139 = vector.load %arg8[%c0_77, %c0_78] : memref<8x32xf32, #tpu.memory_space<vmem>>, vector<8x32xf32>
        %cst_79 = arith.constant dense<0.000000e+00> : vector<8x32xf32>
        %140 = tpu.matmul %138, %139, %cst_79 {dimension_numbers = #tpu.dot_dimension_numbers<[1], [0], [0], [1], [0, 0, 1, 1], [], []>} : vector<8x8xf32>, vector<8x32xf32>, vector<8x32xf32> -> vector<8x32xf32>
        %c0_80 = arith.constant 0 : index
        %c0_81 = arith.constant 0 : index
        %141 = vector.load %arg9[%c0_80, %c0_81] : memref<1x32xf32, #tpu.memory_space<vmem>>, vector<1x32xf32>
        %142 = vector.broadcast %141 : vector<1x32xf32> to vector<8x32xf32>
        %143 = arith.addf %140, %142 : vector<8x32xf32>
        %c0_82 = arith.constant 0 : index
        %c0_83 = arith.constant 0 : index
        %144 = vector.load %arg16[%c0_82, %c0_83] : memref<8x32xf32, #tpu.memory_space<vmem>>, vector<8x32xf32>
        tpu.vector_store %arg16[%c0_82, %c0_83], %143 {strides = array<i32>} : memref<8x32xf32, #tpu.memory_space<vmem>>, vector<8x32xf32>,
        %c0_84 = arith.constant 0 : index
        %c0_85 = arith.constant 0 : index
        %145 = vector.load %arg3[%c0_84, %c0_85] : memref<8x3xf32, #tpu.memory_space<vmem>>, vector<8x3xf32>
        %c0_86 = arith.constant 0 : index
        %c0_87 = arith.constant 0 : index
        %146 = vector.load %arg17[%c0_86, %c0_87] : memref<8x3xf32, #tpu.memory_space<vmem>>, vector<8x3xf32>
        tpu.vector_store %arg17[%c0_86, %c0_87], %145 {strides = array<i32>} : memref<8x3xf32, #tpu.memory_space<vmem>>, vector<8x3xf32>,
      } else {
      }
      %c0_58 = arith.constant 0 : index
      %c0_59 = arith.constant 0 : index
      %121 = vector.load %arg16[%c0_58, %c0_59] : memref<8x32xf32, #tpu.memory_space<vmem>>, vector<8x32xf32>
      %c0_60 = arith.constant 0 : index
      %c0_61 = arith.constant 0 : index
      %c0_62 = arith.constant 0 : index
      %122 = vector.load %arg12[%c0_60, %c0_61, %c0_62] : memref<1x32x96xf32, #tpu.memory_space<vmem>>, vector<1x32x96xf32>
      %123 = vector.shape_cast %122 : vector<1x32x96xf32> to vector<32x96xf32>
      %cst_63 = arith.constant dense<0.000000e+00> : vector<8x96xf32>
      %124 = tpu.matmul %121, %123, %cst_63 {dimension_numbers = #tpu.dot_dimension_numbers<[1], [0], [0], [1], [0, 0, 1, 1], [], []>} : vector<8x32xf32>, vector<32x96xf32>, vector<8x96xf32> -> vector<8x96xf32>
      %c0_64 = arith.constant 0 : index
      %c0_65 = arith.constant 0 : index
      %125 = vector.load %arg17[%c0_64, %c0_65] : memref<8x3xf32, #tpu.memory_space<vmem>>, vector<8x3xf32>
      %126 = vector.extract_strided_slice %124 {offsets = [0, 0], sizes = [8, 32], strides = [1, 1]} : vector<8x96xf32> to vector<8x32xf32>
      %127 = tpu.concatenate %126, %125 in 1 : vector<8x32xf32>, vector<8x3xf32> -> vector<8x35xf32>
      %128 = arith.truncf %127 : vector<8x35xf32> to vector<8x35xbf16>
      %c0_66 = arith.constant 0 : index
      %c0_67 = arith.constant 0 : index
      %129 = vector.load %arg18[%c0_66, %c0_67] : memref<8x35xbf16, #tpu.memory_space<vmem>>, vector<8x35xbf16>
      tpu.vector_store %arg18[%c0_66, %c0_67], %128 {strides = array<i32>} : memref<8x35xbf16, #tpu.memory_space<vmem>>, vector<8x35xbf16>,
      %130 = vector.extract_strided_slice %124 {offsets = [0, 32], sizes = [8, 32], strides = [1, 1]} : vector<8x96xf32> to vector<8x32xf32>
      %131 = tpu.concatenate %130, %125 in 1 : vector<8x32xf32>, vector<8x3xf32> -> vector<8x35xf32>
      %132 = arith.truncf %131 : vector<8x35xf32> to vector<8x35xbf16>
      %c0_68 = arith.constant 0 : index
      %c0_69 = arith.constant 0 : index
      %133 = vector.load %arg19[%c0_68, %c0_69] : memref<8x35xbf16, #tpu.memory_space<vmem>>, vector<8x35xbf16>
      tpu.vector_store %arg19[%c0_68, %c0_69], %132 {strides = array<i32>} : memref<8x35xbf16, #tpu.memory_space<vmem>>, vector<8x35xbf16>,
      %134 = vector.extract_strided_slice %124 {offsets = [0, 64], sizes = [8, 32], strides = [1, 1]} : vector<8x96xf32> to vector<8x32xf32>
      %c0_70 = arith.constant 0 : index
      %c0_71 = arith.constant 0 : index
      %135 = vector.load %arg20[%c0_70, %c0_71] : memref<8x32xf32, #tpu.memory_space<vmem>>, vector<8x32xf32>
      tpu.vector_store %arg20[%c0_70, %c0_71], %134 {strides = array<i32>} : memref<8x32xf32, #tpu.memory_space<vmem>>, vector<8x32xf32>,
      %cst_72 = arith.constant 0.000000e+00 : f32
      %136 = vector.broadcast %cst_72 : f32 to vector<8x35xf32>
      %c0_73 = arith.constant 0 : index
      %c0_74 = arith.constant 0 : index
      %137 = vector.load %arg21[%c0_73, %c0_74] : memref<8x35xf32, #tpu.memory_space<vmem>>, vector<8x35xf32>
      tpu.vector_store %arg21[%c0_73, %c0_74], %136 {strides = array<i32>} : memref<8x35xf32, #tpu.memory_space<vmem>>, vector<8x35xf32>,
    } else {
    }
    %c0 = arith.constant 0 : index
    %c0_1 = arith.constant 0 : index
    %3 = vector.load %arg5[%c0, %c0_1] : memref<32x8xbf16, #tpu.memory_space<vmem>>, vector<32x8xbf16>
    %c0_2 = arith.constant 0 : index
    %c0_3 = arith.constant 0 : index
    %4 = vector.load %arg6[%c0_2, %c0_3] : memref<32x8xbf16, #tpu.memory_space<vmem>>, vector<32x8xbf16>
    %c0_4 = arith.constant 0 : index
    %c0_5 = arith.constant 0 : index
    %5 = vector.load %arg18[%c0_4, %c0_5] : memref<8x35xbf16, #tpu.memory_space<vmem>>, vector<8x35xbf16>
    %cst = arith.constant dense<0.000000e+00> : vector<32x35xf32>
    %6 = tpu.matmul %3, %5, %cst {dimension_numbers = #tpu.dot_dimension_numbers<[1], [0], [0], [1], [0, 0, 1, 1], [], []>} : vector<32x8xbf16>, vector<8x35xbf16>, vector<32x35xf32> -> vector<32x35xf32>
    %c0_6 = arith.constant 0 : index
    %c0_7 = arith.constant 0 : index
    %7 = vector.load %arg19[%c0_6, %c0_7] : memref<8x35xbf16, #tpu.memory_space<vmem>>, vector<8x35xbf16>
    %cst_8 = arith.constant dense<0.000000e+00> : vector<32x35xf32>
    %8 = tpu.matmul %4, %7, %cst_8 {dimension_numbers = #tpu.dot_dimension_numbers<[1], [0], [0], [1], [0, 0, 1, 1], [], []>} : vector<32x8xbf16>, vector<8x35xbf16>, vector<32x35xf32> -> vector<32x35xf32>
    %9 = vector.extract_strided_slice %6 {offsets = [0, 0], sizes = [32, 32], strides = [1, 1]} : vector<32x35xf32> to vector<32x32xf32>
    %10 = vector.extract_strided_slice %6 {offsets = [0, 32], sizes = [32, 3], strides = [1, 1]} : vector<32x35xf32> to vector<32x3xf32>
    %11 = vector.extract_strided_slice %8 {offsets = [0, 0], sizes = [32, 32], strides = [1, 1]} : vector<32x35xf32> to vector<32x32xf32>
    %12 = vector.extract_strided_slice %8 {offsets = [0, 32], sizes = [32, 3], strides = [1, 1]} : vector<32x35xf32> to vector<32x3xf32>
    %13 = arith.subf %10, %12 : vector<32x3xf32>
    %14 = arith.mulf %13, %13 : vector<32x3xf32>
    %cst_9 = arith.constant dense<0.000000e+00> : vector<32xf32>
    %15 = vector.multi_reduction <add>, %14, %cst_9 [1] : vector<32x3xf32> to vector<32xf32>
    %16 = vector.shape_cast %15 : vector<32xf32> to vector<32x1xf32>
    %17 = math.sqrt %16 : vector<32x1xf32>
    %cst_10 = arith.constant 9.99999993E-9 : f32
    %18 = vector.broadcast %cst_10 : f32 to vector<32x1xf32>
    %19 = arith.addf %17, %18 : vector<32x1xf32>
    %20 = tpu.reciprocal %19 {approx = true} : vector<32x1xf32> -> vector<32x1xf32>
    %21 = vector.broadcast %20 : vector<32x1xf32> to vector<32x3xf32>
    %22 = arith.mulf %13, %21 : vector<32x3xf32>
    %23 = arith.addf %9, %11 : vector<32x32xf32>
    %c0_11 = arith.constant 0 : index
    %c0_12 = arith.constant 0 : index
    %c0_13 = arith.constant 0 : index
    %24 = vector.load %arg14[%c0_11, %c0_12, %c0_13] : memref<1x16x32xf32, #tpu.memory_space<vmem>>, vector<1x1x32xf32>
    %25 = vector.shape_cast %24 : vector<1x1x32xf32> to vector<1x32xf32>
    %26 = vector.broadcast %16 : vector<32x1xf32> to vector<32x32xf32>
    %27 = vector.broadcast %25 : vector<1x32xf32> to vector<32x32xf32>
    %28 = arith.mulf %26, %27 : vector<32x32xf32>
    %29 = arith.addf %23, %28 : vector<32x32xf32>
    %c0_14 = arith.constant 0 : index
    %c0_15 = arith.constant 0 : index
    %30 = vector.load %arg7[%c0_14, %c0_15] : memref<32x32xf32, #tpu.memory_space<vmem>>, vector<32x32xf32>
    %c0_16 = arith.constant 0 : index
    %c0_17 = arith.constant 0 : index
    %c0_18 = arith.constant 0 : index
    %31 = vector.load %arg13[%c0_16, %c0_17, %c0_18] : memref<1x192x32xf32, #tpu.memory_space<vmem>>, vector<1x32x32xf32>
    %32 = vector.shape_cast %31 : vector<1x32x32xf32> to vector<32x32xf32>
    %cst_19 = arith.constant dense<0.000000e+00> : vector<32x32xf32>
    %33 = tpu.matmul %30, %32, %cst_19 {dimension_numbers = #tpu.dot_dimension_numbers<[1], [0], [0], [1], [0, 0, 1, 1], [], []>} : vector<32x32xf32>, vector<32x32xf32>, vector<32x32xf32> -> vector<32x32xf32>
    %34 = arith.addf %29, %33 : vector<32x32xf32>
    %c0_20 = arith.constant 0 : index
    %c1 = arith.constant 1 : index
    %c0_21 = arith.constant 0 : index
    %35 = vector.load %arg14[%c0_20, %c1, %c0_21] : memref<1x16x32xf32, #tpu.memory_space<vmem>>, vector<1x1x32xf32>
    %36 = vector.shape_cast %35 : vector<1x1x32xf32> to vector<1x32xf32>
    %37 = vector.broadcast %36 : vector<1x32xf32> to vector<32x32xf32>
    %38 = arith.addf %34, %37 : vector<32x32xf32>
    %39 = arith.negf %38 : vector<32x32xf32>
    %40 = math.exp %39 : vector<32x32xf32>
    %cst_22 = arith.constant 1.000000e+00 : f32
    %41 = vector.broadcast %cst_22 : f32 to vector<32x32xf32>
    %42 = arith.addf %41, %40 : vector<32x32xf32>
    %43 = arith.divf %41, %42 : vector<32x32xf32>
    %44 = arith.mulf %38, %43 : vector<32x32xf32>
    %c0_23 = arith.constant 0 : index
    %c32 = arith.constant 32 : index
    %c0_24 = arith.constant 0 : index
    %45 = vector.load %arg13[%c0_23, %c32, %c0_24] : memref<1x192x32xf32, #tpu.memory_space<vmem>>, vector<1x32x32xf32>
    %46 = vector.shape_cast %45 : vector<1x32x32xf32> to vector<32x32xf32>
    %cst_25 = arith.constant dense<0.000000e+00> : vector<32x32xf32>
    %47 = tpu.matmul %44, %46, %cst_25 {dimension_numbers = #tpu.dot_dimension_numbers<[1], [0], [0], [1], [0, 0, 1, 1], [], []>} : vector<32x32xf32>, vector<32x32xf32>, vector<32x32xf32> -> vector<32x32xf32>
    %c0_26 = arith.constant 0 : index
    %c2 = arith.constant 2 : index
    %c0_27 = arith.constant 0 : index
    %48 = vector.load %arg14[%c0_26, %c2, %c0_27] : memref<1x16x32xf32, #tpu.memory_space<vmem>>, vector<1x1x32xf32>
    %49 = vector.shape_cast %48 : vector<1x1x32xf32> to vector<1x32xf32>
    %50 = vector.broadcast %49 : vector<1x32xf32> to vector<32x32xf32>
    %51 = arith.addf %47, %50 : vector<32x32xf32>
    %52 = arith.negf %51 : vector<32x32xf32>
    %53 = math.exp %52 : vector<32x32xf32>
    %cst_28 = arith.constant 1.000000e+00 : f32
    %54 = vector.broadcast %cst_28 : f32 to vector<32x32xf32>
    %55 = arith.addf %54, %53 : vector<32x32xf32>
    %56 = arith.divf %54, %55 : vector<32x32xf32>
    %57 = arith.mulf %51, %56 : vector<32x32xf32>
    %c0_29 = arith.constant 0 : index
    %c64 = arith.constant 64 : index
    %c0_30 = arith.constant 0 : index
    %58 = vector.load %arg13[%c0_29, %c64, %c0_30] : memref<1x192x32xf32, #tpu.memory_space<vmem>>, vector<1x32x32xf32>
    %59 = vector.shape_cast %58 : vector<1x32x32xf32> to vector<32x32xf32>
    %cst_31 = arith.constant dense<0.000000e+00> : vector<32x32xf32>
    %60 = tpu.matmul %57, %59, %cst_31 {dimension_numbers = #tpu.dot_dimension_numbers<[1], [0], [0], [1], [0, 0, 1, 1], [], []>} : vector<32x32xf32>, vector<32x32xf32>, vector<32x32xf32> -> vector<32x32xf32>
    %c0_32 = arith.constant 0 : index
    %c3 = arith.constant 3 : index
    %c0_33 = arith.constant 0 : index
    %61 = vector.load %arg14[%c0_32, %c3, %c0_33] : memref<1x16x32xf32, #tpu.memory_space<vmem>>, vector<1x1x32xf32>
    %62 = vector.shape_cast %61 : vector<1x1x32xf32> to vector<1x32xf32>
    %63 = vector.broadcast %62 : vector<1x32xf32> to vector<32x32xf32>
    %64 = arith.addf %60, %63 : vector<32x32xf32>
    %65 = arith.negf %64 : vector<32x32xf32>
    %66 = math.exp %65 : vector<32x32xf32>
    %cst_34 = arith.constant 1.000000e+00 : f32
    %67 = vector.broadcast %cst_34 : f32 to vector<32x32xf32>
    %68 = arith.addf %67, %66 : vector<32x32xf32>
    %69 = arith.divf %67, %68 : vector<32x32xf32>
    %70 = arith.mulf %64, %69 : vector<32x32xf32>
    %c0_35 = arith.constant 0 : index
    %c4 = arith.constant 4 : index
    %c0_36 = arith.constant 0 : index
    %71 = vector.load %arg14[%c0_35, %c4, %c0_36] : memref<1x16x32xf32, #tpu.memory_space<vmem>>, vector<1x1x32xf32>
    %72 = vector.shape_cast %71 : vector<1x1x32xf32> to vector<1x32xf32>
    %73 = vector.broadcast %72 : vector<1x32xf32> to vector<32x32xf32>
    %74 = arith.mulf %70, %73 : vector<32x32xf32>
    %cst_37 = arith.constant dense<0.000000e+00> : vector<32xf32>
    %75 = vector.multi_reduction <add>, %74, %cst_37 [1] : vector<32x32xf32> to vector<32xf32>
    %76 = vector.shape_cast %75 : vector<32xf32> to vector<32x1xf32>
    %c0_38 = arith.constant 0 : index
    %c11 = arith.constant 11 : index
    %c0_39 = arith.constant 0 : index
    %77 = vector.load %arg14[%c0_38, %c11, %c0_39] : memref<1x16x32xf32, #tpu.memory_space<vmem>>, vector<1x1x1xf32>
    %78 = vector.shape_cast %77 : vector<1x1x1xf32> to vector<1x1xf32>
    %79 = vector.broadcast %78 : vector<1x1xf32> to vector<32x1xf32>
    %80 = arith.addf %76, %79 : vector<32x1xf32>
    %81 = arith.negf %80 : vector<32x1xf32>
    %82 = math.exp %81 : vector<32x1xf32>
    %cst_40 = arith.constant 1.000000e+00 : f32
    %83 = vector.broadcast %cst_40 : f32 to vector<32x1xf32>
    %84 = arith.addf %83, %82 : vector<32x1xf32>
    %85 = arith.divf %83, %84 : vector<32x1xf32>
    %86 = vector.broadcast %85 : vector<32x1xf32> to vector<32x32xf32>
    %87 = arith.mulf %57, %86 : vector<32x32xf32>
    %c0_41 = arith.constant 0 : index
    %c96 = arith.constant 96 : index
    %c0_42 = arith.constant 0 : index
    %88 = vector.load %arg13[%c0_41, %c96, %c0_42] : memref<1x192x32xf32, #tpu.memory_space<vmem>>, vector<1x32x32xf32>
    %89 = vector.shape_cast %88 : vector<1x32x32xf32> to vector<32x32xf32>
    %cst_43 = arith.constant dense<0.000000e+00> : vector<32x32xf32>
    %90 = tpu.matmul %87, %89, %cst_43 {dimension_numbers = #tpu.dot_dimension_numbers<[1], [0], [0], [1], [0, 0, 1, 1], [], []>} : vector<32x32xf32>, vector<32x32xf32>, vector<32x32xf32> -> vector<32x32xf32>
    %c0_44 = arith.constant 0 : index
    %c5 = arith.constant 5 : index
    %c0_45 = arith.constant 0 : index
    %91 = vector.load %arg14[%c0_44, %c5, %c0_45] : memref<1x16x32xf32, #tpu.memory_space<vmem>>, vector<1x1x32xf32>
    %92 = vector.shape_cast %91 : vector<1x1x32xf32> to vector<1x32xf32>
    %93 = vector.broadcast %92 : vector<1x32xf32> to vector<32x32xf32>
    %94 = arith.addf %90, %93 : vector<32x32xf32>
    %95 = arith.negf %94 : vector<32x32xf32>
    %96 = math.exp %95 : vector<32x32xf32>
    %cst_46 = arith.constant 1.000000e+00 : f32
    %97 = vector.broadcast %cst_46 : f32 to vector<32x32xf32>
    %98 = arith.addf %97, %96 : vector<32x32xf32>
    %99 = arith.divf %97, %98 : vector<32x32xf32>
    %100 = arith.mulf %94, %99 : vector<32x32xf32>
    %c0_47 = arith.constant 0 : index
    %c6 = arith.constant 6 : index
    %c0_48 = arith.constant 0 : index
    %101 = vector.load %arg14[%c0_47, %c6, %c0_48] : memref<1x16x32xf32, #tpu.memory_space<vmem>>, vector<1x1x32xf32>
    %102 = vector.shape_cast %101 : vector<1x1x32xf32> to vector<1x32xf32>
    %103 = vector.broadcast %102 : vector<1x32xf32> to vector<32x32xf32>
    %104 = arith.mulf %100, %103 : vector<32x32xf32>
    %cst_49 = arith.constant dense<0.000000e+00> : vector<32xf32>
    %105 = vector.multi_reduction <add>, %104, %cst_49 [1] : vector<32x32xf32> to vector<32xf32>
    %106 = vector.shape_cast %105 : vector<32xf32> to vector<32x1xf32>
    %107 = vector.broadcast %106 : vector<32x1xf32> to vector<32x3xf32>
    %108 = arith.mulf %22, %107 : vector<32x3xf32>
    %109 = tpu.concatenate %87, %108 in 1 : vector<32x32xf32>, vector<32x3xf32> -> vector<32x35xf32>
    %110 = arith.truncf %109 : vector<32x35xf32> to vector<32x35xbf16>
    %c0_50 = arith.constant 0 : index
    %c0_51 = arith.constant 0 : index
    %111 = vector.load %arg21[%c0_50, %c0_51] : memref<8x35xf32, #tpu.memory_space<vmem>>, vector<8x35xf32>
    %cst_52 = arith.constant dense<0.000000e+00> : vector<8x35xf32>
    %112 = tpu.matmul %3, %110, %cst_52 {dimension_numbers = #tpu.dot_dimension_numbers<[0], [0], [1], [1], [0, 1, 1, 1], [], []>} : vector<32x8xbf16>, vector<32x35xbf16>, vector<8x35xf32> -> vector<8x35xf32>
    %113 = arith.addf %111, %112 : vector<8x35xf32>
    %c0_53 = arith.constant 0 : index
    %c0_54 = arith.constant 0 : index
    %114 = vector.load %arg21[%c0_53, %c0_54] : memref<8x35xf32, #tpu.memory_space<vmem>>, vector<8x35xf32>
    tpu.vector_store %arg21[%c0_53, %c0_54], %113 {strides = array<i32>} : memref<8x35xf32, #tpu.memory_space<vmem>>, vector<8x35xf32>,
    %c1_i32 = arith.constant 1 : i32
    %115 = arith.cmpi eq, %arg1, %c1_i32 : i32
    %116 = arith.extui %115 : i1 to i32
    %c0_i32_55 = arith.constant 0 : i32
    %117 = arith.cmpi ne, %116, %c0_i32_55 : i32
    scf.if %117 {
      %c0_56 = arith.constant 0 : index
      %c0_57 = arith.constant 0 : index
      %118 = vector.load %arg21[%c0_56, %c0_57] : memref<8x35xf32, #tpu.memory_space<vmem>>, vector<8x35xf32>
      %c0_58 = arith.constant 0 : index
      %c0_59 = arith.constant 0 : index
      %119 = vector.load %arg16[%c0_58, %c0_59] : memref<8x32xf32, #tpu.memory_space<vmem>>, vector<8x32xf32>
      %c0_60 = arith.constant 0 : index
      %c0_61 = arith.constant 0 : index
      %120 = vector.load %arg17[%c0_60, %c0_61] : memref<8x3xf32, #tpu.memory_space<vmem>>, vector<8x3xf32>
      %121 = vector.extract_strided_slice %118 {offsets = [0, 32], sizes = [8, 3], strides = [1, 1]} : vector<8x35xf32> to vector<8x3xf32>
      %c0_62 = arith.constant 0 : index
      %c0_63 = arith.constant 0 : index
      %122 = vector.load %arg4[%c0_62, %c0_63] : memref<8x1xf32, #tpu.memory_space<vmem>>, vector<8x1xf32>
      %123 = vector.broadcast %122 : vector<8x1xf32> to vector<8x3xf32>
      %124 = arith.mulf %121, %123 : vector<8x3xf32>
      %125 = arith.addf %120, %124 : vector<8x3xf32>
      %c0_64 = arith.constant 0 : index
      %c0_65 = arith.constant 0 : index
      %126 = vector.load %arg17[%c0_64, %c0_65] : memref<8x3xf32, #tpu.memory_space<vmem>>, vector<8x3xf32>
      tpu.vector_store %arg17[%c0_64, %c0_65], %125 {strides = array<i32>} : memref<8x3xf32, #tpu.memory_space<vmem>>, vector<8x3xf32>,
      %c0_66 = arith.constant 0 : index
      %c0_67 = arith.constant 0 : index
      %127 = vector.load %arg20[%c0_66, %c0_67] : memref<8x32xf32, #tpu.memory_space<vmem>>, vector<8x32xf32>
      %128 = vector.extract_strided_slice %118 {offsets = [0, 0], sizes = [8, 32], strides = [1, 1]} : vector<8x35xf32> to vector<8x32xf32>
      %c0_68 = arith.constant 0 : index
      %c128 = arith.constant 128 : index
      %c0_69 = arith.constant 0 : index
      %129 = vector.load %arg13[%c0_68, %c128, %c0_69] : memref<1x192x32xf32, #tpu.memory_space<vmem>>, vector<1x32x32xf32>
      %130 = vector.shape_cast %129 : vector<1x32x32xf32> to vector<32x32xf32>
      %cst_70 = arith.constant dense<0.000000e+00> : vector<8x32xf32>
      %131 = tpu.matmul %128, %130, %cst_70 {dimension_numbers = #tpu.dot_dimension_numbers<[1], [0], [0], [1], [0, 0, 1, 1], [], []>} : vector<8x32xf32>, vector<32x32xf32>, vector<8x32xf32> -> vector<8x32xf32>
      %132 = arith.addf %127, %131 : vector<8x32xf32>
      %c0_71 = arith.constant 0 : index
      %c7 = arith.constant 7 : index
      %c0_72 = arith.constant 0 : index
      %133 = vector.load %arg14[%c0_71, %c7, %c0_72] : memref<1x16x32xf32, #tpu.memory_space<vmem>>, vector<1x1x32xf32>
      %134 = vector.shape_cast %133 : vector<1x1x32xf32> to vector<1x32xf32>
      %135 = vector.broadcast %134 : vector<1x32xf32> to vector<8x32xf32>
      %136 = arith.addf %132, %135 : vector<8x32xf32>
      %137 = arith.negf %136 : vector<8x32xf32>
      %138 = math.exp %137 : vector<8x32xf32>
      %cst_73 = arith.constant 1.000000e+00 : f32
      %139 = vector.broadcast %cst_73 : f32 to vector<8x32xf32>
      %140 = arith.addf %139, %138 : vector<8x32xf32>
      %141 = arith.divf %139, %140 : vector<8x32xf32>
      %142 = arith.mulf %136, %141 : vector<8x32xf32>
      %c0_74 = arith.constant 0 : index
      %c160 = arith.constant 160 : index
      %c0_75 = arith.constant 0 : index
      %143 = vector.load %arg13[%c0_74, %c160, %c0_75] : memref<1x192x32xf32, #tpu.memory_space<vmem>>, vector<1x32x32xf32>
      %144 = vector.shape_cast %143 : vector<1x32x32xf32> to vector<32x32xf32>
      %cst_76 = arith.constant dense<0.000000e+00> : vector<8x32xf32>
      %145 = tpu.matmul %142, %144, %cst_76 {dimension_numbers = #tpu.dot_dimension_numbers<[1], [0], [0], [1], [0, 0, 1, 1], [], []>} : vector<8x32xf32>, vector<32x32xf32>, vector<8x32xf32> -> vector<8x32xf32>
      %146 = arith.addf %119, %145 : vector<8x32xf32>
      %c0_77 = arith.constant 0 : index
      %c8 = arith.constant 8 : index
      %c0_78 = arith.constant 0 : index
      %147 = vector.load %arg14[%c0_77, %c8, %c0_78] : memref<1x16x32xf32, #tpu.memory_space<vmem>>, vector<1x1x32xf32>
      %148 = vector.shape_cast %147 : vector<1x1x32xf32> to vector<1x32xf32>
      %149 = vector.broadcast %148 : vector<1x32xf32> to vector<8x32xf32>
      %150 = arith.addf %146, %149 : vector<8x32xf32>
      %cst_79 = arith.constant dense<0.000000e+00> : vector<8xf32>
      %151 = vector.multi_reduction <add>, %150, %cst_79 [1] : vector<8x32xf32> to vector<8xf32>
      %152 = vector.shape_cast %151 : vector<8xf32> to vector<8x1xf32>
      %cst_80 = arith.constant 3.200000e+01 : f32
      %153 = vector.broadcast %cst_80 : f32 to vector<8x1xf32>
      %154 = arith.divf %152, %153 : vector<8x1xf32>
      %155 = vector.broadcast %154 : vector<8x1xf32> to vector<8x32xf32>
      %156 = arith.subf %150, %155 : vector<8x32xf32>
      %157 = arith.mulf %156, %156 : vector<8x32xf32>
      %cst_81 = arith.constant dense<0.000000e+00> : vector<8xf32>
      %158 = vector.multi_reduction <add>, %157, %cst_81 [1] : vector<8x32xf32> to vector<8xf32>
      %159 = vector.shape_cast %158 : vector<8xf32> to vector<8x1xf32>
      %cst_82 = arith.constant 3.200000e+01 : f32
      %160 = vector.broadcast %cst_82 : f32 to vector<8x1xf32>
      %161 = arith.divf %159, %160 : vector<8x1xf32>
      %162 = vector.broadcast %154 : vector<8x1xf32> to vector<8x32xf32>
      %163 = arith.subf %150, %162 : vector<8x32xf32>
      %cst_83 = arith.constant 9.99999974E-6 : f32
      %164 = vector.broadcast %cst_83 : f32 to vector<8x1xf32>
      %165 = arith.addf %161, %164 : vector<8x1xf32>
      %166 = math.rsqrt %165 : vector<8x1xf32>
      %167 = vector.broadcast %166 : vector<8x1xf32> to vector<8x32xf32>
      %168 = arith.mulf %163, %167 : vector<8x32xf32>
      %c0_84 = arith.constant 0 : index
      %c9 = arith.constant 9 : index
      %c0_85 = arith.constant 0 : index
      %169 = vector.load %arg14[%c0_84, %c9, %c0_85] : memref<1x16x32xf32, #tpu.memory_space<vmem>>, vector<1x1x32xf32>
      %170 = vector.shape_cast %169 : vector<1x1x32xf32> to vector<1x32xf32>
      %171 = vector.broadcast %170 : vector<1x32xf32> to vector<8x32xf32>
      %172 = arith.mulf %168, %171 : vector<8x32xf32>
      %c0_86 = arith.constant 0 : index
      %c10 = arith.constant 10 : index
      %c0_87 = arith.constant 0 : index
      %173 = vector.load %arg14[%c0_86, %c10, %c0_87] : memref<1x16x32xf32, #tpu.memory_space<vmem>>, vector<1x1x32xf32>
      %174 = vector.shape_cast %173 : vector<1x1x32xf32> to vector<1x32xf32>
      %175 = vector.broadcast %174 : vector<1x32xf32> to vector<8x32xf32>
      %176 = arith.addf %172, %175 : vector<8x32xf32>
      %c0_88 = arith.constant 0 : index
      %c0_89 = arith.constant 0 : index
      %177 = vector.load %arg16[%c0_88, %c0_89] : memref<8x32xf32, #tpu.memory_space<vmem>>, vector<8x32xf32>
      tpu.vector_store %arg16[%c0_88, %c0_89], %176 {strides = array<i32>} : memref<8x32xf32, #tpu.memory_space<vmem>>, vector<8x32xf32>,
      %c1_i32_90 = arith.constant 1 : i32
      %178 = arith.cmpi eq, %arg0, %c1_i32_90 : i32
      %179 = arith.extui %178 : i1 to i32
      %c0_i32_91 = arith.constant 0 : i32
      %180 = arith.cmpi ne, %179, %c0_i32_91 : i32
      scf.if %180 {
        %c0_92 = arith.constant 0 : index
        %c0_93 = arith.constant 0 : index
        %181 = vector.load %arg16[%c0_92, %c0_93] : memref<8x32xf32, #tpu.memory_space<vmem>>, vector<8x32xf32>
        %c0_94 = arith.constant 0 : index
        %c0_95 = arith.constant 0 : index
        %182 = vector.load %arg10[%c0_94, %c0_95] : memref<32x8xf32, #tpu.memory_space<vmem>>, vector<32x8xf32>
        %cst_96 = arith.constant dense<0.000000e+00> : vector<8x8xf32>
        %183 = tpu.matmul %181, %182, %cst_96 {dimension_numbers = #tpu.dot_dimension_numbers<[1], [0], [0], [1], [0, 0, 1, 1], [], []>} : vector<8x32xf32>, vector<32x8xf32>, vector<8x8xf32> -> vector<8x8xf32>
        %c0_97 = arith.constant 0 : index
        %c0_98 = arith.constant 0 : index
        %184 = vector.load %arg11[%c0_97, %c0_98] : memref<1x8xf32, #tpu.memory_space<vmem>>, vector<1x8xf32>
        %185 = vector.broadcast %184 : vector<1x8xf32> to vector<8x8xf32>
        %186 = arith.addf %183, %185 : vector<8x8xf32>
        %c0_99 = arith.constant 0 : index
        %c0_100 = arith.constant 0 : index
        %187 = vector.load %arg17[%c0_99, %c0_100] : memref<8x3xf32, #tpu.memory_space<vmem>>, vector<8x3xf32>
        %cst_101 = arith.constant 0.000000e+00 : f32
        %188 = vector.broadcast %cst_101 : f32 to vector<8x117xf32>
        %189 = tpu.concatenate %186, %187, %188 in 1 : vector<8x8xf32>, vector<8x3xf32>, vector<8x117xf32> -> vector<8x128xf32>
        %c0_102 = arith.constant 0 : index
        %c0_103 = arith.constant 0 : index
        %190 = vector.load %arg15[%c0_102, %c0_103] : memref<8x128xf32, #tpu.memory_space<vmem>>, vector<8x128xf32>
        tpu.vector_store %arg15[%c0_102, %c0_103], %189 {strides = array<i32>} : memref<8x128xf32, #tpu.memory_space<vmem>>, vector<8x128xf32>,
      } else {
      }
    } else {
    }
    return
  }
  func.func @transform_0(%arg0: i32, %arg1: i32) -> (i32, i32) {
    %c0_i32 = arith.constant 0 : i32
    %c0_i32_0 = arith.constant 0 : i32
    %c0_i32_1 = arith.constant 0 : i32
    return %c0_i32, %c0_i32_0 : i32, i32
  }
  func.func @transform_1(%arg0: i32, %arg1: i32) -> (i32, i32) {
    %c0_i32 = arith.constant 0 : i32
    %c0_i32_0 = arith.constant 0 : i32
    %c0_i32_1 = arith.constant 0 : i32
    return %c0_i32, %c0_i32_0 : i32, i32
  }
  func.func @transform_2(%arg0: i32, %arg1: i32) -> (i32, i32) {
    %c0_i32 = arith.constant 0 : i32
    %c0_i32_0 = arith.constant 0 : i32
    %c0_i32_1 = arith.constant 0 : i32
    return %c0_i32, %c0_i32_0 : i32, i32
  }
  func.func @transform_3(%arg0: i32, %arg1: i32) -> (i32, i32) {
    %c0_i32 = arith.constant 0 : i32
    %c0_i32_0 = arith.constant 0 : i32
    return %arg1, %c0_i32 : i32, i32
  }
  func.func @transform_4(%arg0: i32, %arg1: i32) -> (i32, i32) {
    %c0_i32 = arith.constant 0 : i32
    %c0_i32_0 = arith.constant 0 : i32
    return %arg1, %c0_i32 : i32, i32
  }
  func.func @transform_5(%arg0: i32, %arg1: i32) -> (i32, i32) {
    %c0_i32 = arith.constant 0 : i32
    %c0_i32_0 = arith.constant 0 : i32
    return %arg1, %c0_i32 : i32, i32
  }
  func.func @transform_6(%arg0: i32, %arg1: i32) -> (i32, i32) {
    %c0_i32 = arith.constant 0 : i32
    %c0_i32_0 = arith.constant 0 : i32
    %c0_i32_1 = arith.constant 0 : i32
    return %c0_i32, %c0_i32_0 : i32, i32
  }
  func.func @transform_7(%arg0: i32, %arg1: i32) -> (i32, i32) {
    %c0_i32 = arith.constant 0 : i32
    %c0_i32_0 = arith.constant 0 : i32
    %c0_i32_1 = arith.constant 0 : i32
    return %c0_i32, %c0_i32_0 : i32, i32
  }
  func.func @transform_8(%arg0: i32, %arg1: i32) -> (i32, i32) {
    %c0_i32 = arith.constant 0 : i32
    %c0_i32_0 = arith.constant 0 : i32
    %c0_i32_1 = arith.constant 0 : i32
    return %c0_i32, %c0_i32_0 : i32, i32
  }
  func.func @transform_9(%arg0: i32, %arg1: i32) -> (i32, i32) {
    %c0_i32 = arith.constant 0 : i32
    %c0_i32_0 = arith.constant 0 : i32
    %c0_i32_1 = arith.constant 0 : i32
    return %c0_i32, %c0_i32_0 : i32, i32
  }
  func.func @transform_10(%arg0: i32, %arg1: i32) -> (i32, i32, i32) {
    %c0_i32 = arith.constant 0 : i32
    %c0_i32_0 = arith.constant 0 : i32
    %c0_i32_1 = arith.constant 0 : i32
    return %arg0, %c0_i32, %c0_i32_0 : i32, i32, i32
  }
  func.func @transform_11(%arg0: i32, %arg1: i32) -> (i32, i32, i32) {
    %c0_i32 = arith.constant 0 : i32
    %c0_i32_0 = arith.constant 0 : i32
    %c0_i32_1 = arith.constant 0 : i32
    return %arg0, %c0_i32, %c0_i32_0 : i32, i32, i32
  }
  func.func @transform_12(%arg0: i32, %arg1: i32) -> (i32, i32, i32) {
    %c0_i32 = arith.constant 0 : i32
    %c0_i32_0 = arith.constant 0 : i32
    %c0_i32_1 = arith.constant 0 : i32
    return %arg0, %c0_i32, %c0_i32_0 : i32, i32, i32
  }
  func.func @transform_13(%arg0: i32, %arg1: i32) -> (i32, i32) {
    %c0_i32 = arith.constant 0 : i32
    %c0_i32_0 = arith.constant 0 : i32
    %c0_i32_1 = arith.constant 0 : i32
    return %c0_i32, %c0_i32_0 : i32, i32
  }
}

</mosaic_0001>

<bundles_post_ra>
// kernel: _lambda_.1
= control target key start
LH: loop header
LB: loop body
LE: loop exit
PB: predicated region body
PF: predicated region fallthrough
CT: control target
= control target key end

     0   :  { %s2763_s25 = smov 0   ;;  %s2765_s26 = smov 0   ;;  %s3075_s0 = inlined_call_operand.vmem [shape: f32[8,8], index: 0, kind: input, shape index: {}]   ;;  %s3076_s1 = inlined_call_operand.vmem [shape: f32[8,3], index: 1, kind: input, shape index: {}]   ;;  %s3077_s2 = inlined_call_operand.vmem [shape: f32[8,1], index: 2, kind: input, shape index: {}]   ;;  %s3078_s3 = inlined_call_operand.vmem [shape: bf16[64,8], index: 3, kind: input, shape index: {}]   ;;  %s3079_s4 = inlined_call_operand.vmem [shape: bf16[64,8], index: 4, kind: input, shape index: {}]   ;;  %s3080_s5 = inlined_call_operand.vmem [shape: f32[64,32], index: 5, kind: input, shape index: {}]   ;;  %s3081_s6 = inlined_call_operand.vmem [shape: f32[8,32], index: 6, kind: input, shape index: {}]   ;;  %s3082_s7 = inlined_call_operand.vmem [shape: f32[1,32], index: 7, kind: input, shape index: {}]   ;;  %s3083_s8 = inlined_call_operand.vmem [shape: f32[32,8], index: 8, kind: input, shape index: {}]   ;;  %s3084_s9 = inlined_call_operand.vmem [shape: f32[1,8], index: 9, kind: input, shape index: {}]   ;;  %s3085_s10 = inlined_call_operand.vmem [shape: f32[2,32,96], index: 10, kind: input, shape index: {}]   ;;  %s3086_s11 = inlined_call_operand.vmem [shape: f32[2,192,32], index: 11, kind: input, shape index: {}]   ;;  %s3087_s12 = inlined_call_operand.vmem [shape: f32[2,16,32], index: 12, kind: input, shape index: {}]   ;;  %s3088_s13 = inlined_call_operand.vmem [shape: f32[8,128], index: 13, kind: output, shape index: {}]  }
   0x1   :  { %3093 = sst [smem:[#allocation13_spill]] %s3077_s2  ;;  %s2767_s27 = smov 0  }
   0x2   :  { %3094 = sst [smem:[#allocation14_spill]] %s3078_s3  ;;  %s2769_s28 = smov 0  }
   0x3   :  { %3095 = sst [smem:[#allocation15_spill]] %s3083_s8  ;;  %s2771_s29 = smov 0  }
   0x4   :  { %3096 = sst [smem:[#allocation16_spill]] %s3084_s9 }
   0x5   :  { %3097 = sst [smem:[#allocation17_spill]] %s3088_s13 }
   0x6 LB: > { %3098 = sst [smem:[#allocation8_spill]] %s2662_s27  ;;  %s32_s30 = sadd.s32 1, %s2662_s27  ;;  %s2670_s29 = sphi %s2771_s29, %s23_s29   ;;  %s2666_s28 = sphi %s2769_s28, %s3112_s28   ;;  %s2662_s27 = sphi %s2767_s27, %s3111_s27   ;;  %s2658_s26 = sphi %s2765_s26, %s3110_s26   ;;  %s2654_s25 = sphi %s2763_s25, %s3109_s25  }
   0x7   : > { %3099 = sst [smem:[#allocation9_spill]] %s2666_s28  ;;  %s35_s14 = sadd.s32 1, %s2666_s28 }
   0x8   : > { %3100 = sst [smem:[#allocation10_spill]] %s2670_s29  ;;  %p33_p0 = scmp.ge.s32.totalorder %s32_s30, 2 }
   0x9   : > { %p2130_p1 = scmp.ge.s32.totalorder %s2670_s29, 1  ;;  %p447_p2 = scmp.lt.s32.totalorder %s2670_s29, 5 }
   0xa   : > { %s3114_s30 = smov (%p33_p0, %s32_s30), 0  ;;  %s3116_s14 = smov (!%p33_p0, %s35_s14), %s2666_s28 }
   0xb   : > { %3101 = sst [smem:[#allocation11_spill]] %s3114_s30  ;;  %p448_p3 = pnand %p2130_p1, %p447_p2 }
   0xc   : > { %p37_p4 = scmp.ge.s32.totalorder %s3116_s14, 2  ;;  %s2131_s15 = sshll.u32 (!%p448_p3), %s2654_s25, 2 }
   0xd   : > { %451 = sbr.rel (%p448_p3) target bundleno = 3530 (0xdca), region = 72  ;;  %p529_p5 = scmp.lt.s32.totalorder (!%p448_p3), %s2658_s26, 1 }
   0xe   : > { %s3118_s14 = smov (%p37_p4, %s3116_s14), 0  ;;  %p512_p6 = scmp.lt.s32.totalorder (!%p448_p3), %s2131_s15, 7 }
   0xf   : > { %3102 = sst [smem:[#allocation12_spill]] %s3118_s14  ;;  %s3103_s3 = sld [smem:[#allocation14_spill]] (!%p448_p3) }
  0x10   : > { %p2142_p7 = scmp.ne.s32.totalorder (!%p448_p3), %s2654_s25, 0 }
  0x14   : > { %s530_s16 = scalar_select %p529_p5, %s2658_s26, 1 }
  0x15   : > { %s3120_s15 = smov (!%p512_p6, %s2131_s15), 7  ;;  %548 = sbr.rel (%p2142_p7) target bundleno = 587 (0x24b), region = 76 }
  0x16   : > { %s2213_s17 = sshll.u32 %s530_s16, 5  ;;  %s2461_s18 = smul.u32 192, %s530_s16 }
  0x17   : > { %s2132_s19 = sshll.u32 %s3120_s15, 2  ;;  %s2136_s20 = sshll.u32 %s3120_s15, 3 }
  0x18   : > { %s2803_s23 = scalar_lea.vmem %s3103_s3, %s2132_s19  ;;  %s2808_s30 = scalar_lea.vmem %s3079_s4, %s2132_s19 }
  0x19   : > { %s2813_s29 = scalar_lea.vmem %s3080_s5, %s2136_s20  ;;  %s2818_s8 = scalar_lea.vmem %s3085_s10, %s2213_s17 }
  0x1a   : > { %s2823_s21 = scalar_lea.vmem %s3086_s11, %s2461_s18  ;;  %s2214_s22 = sshll.u32 %s530_s16, 4 }
  0x1b   : > { %s2828_s19 = scalar_lea.vmem %s3087_s12, %s2214_s22  ;;  %p2143_p8 = scmp.ne.s32.totalorder (!%p2142_p7), %s2658_s26, 0 }
  0x1c   : > { %v554_v0 = vld [vmem:[%s3081_s6] sm:$0xff] (!%p2143_p8)  ;;  %vm562_vm0 = vcmask (!%p2143_p8), 64512   ;;  %v2672_v2 = vmov (!%p2143_p8), 0.0   ;;  %vm2673_vm1 = vmmov (!%p2143_p8), 0   ;;  %vm639_vm2 = vcmask (!%p2143_p8), 23552  }
  0x1d   : > { %552 = sbr.rel (%p2143_p8) target bundleno = 246 (0xf6), region = 80  ;;  %v553_v1 = vld [vmem:[%s3075_s0] sm:$0xff] (!%p2143_p8)  ;;  %2278 = vmatprep.subr.mxu0 (!%p2143_p8), %v2672_v2  ;;  %2280 = vmatprep.mubr.msk.f32.mxu0 (!%p2143_p8), %vm2673_vm1, %v2672_v2  ;;  %vm636_vm3 = vcmask (!%p2143_p8), 261120  }
  0x1e   : > { %2279 = vmatpush3.msra.mxu0 (!%p2143_p8), %v554_v0  ;;  %v638_v3 = vld [vmem:[%s3076_s1] sm:$0xff] (!%p2143_p8) }
  0x1f   : > { %2281 = vmatmul.mubr.msk.f32.vlgmr.msra.gmra.mrb[0].mxu0 (!%p2143_p8), %vm562_vm0, %v553_v1  ;;  %640 = vst.msk [vmem:[#allocation3] sm:$0xff] (!%p2143_p8), %vm639_vm2, %v638_v3  ;;  %v2144_v4 = vld [vmem:[%s3082_s7] ss:$0 sm:$0xff] (!%p2143_p8) }
  0xf2   : > { %v632_v5 = vpop.f32.mrb[0].mxu0 }
  0xf3   : > { %v633_v6 = vadd.f32 %v2144_v4, %v632_v5  ;;  %v2282_v7 = vpop.f32.mrb[1].mxu0 }
  0xf5   : > { %637 = vst.msk [vmem:[#allocation2] sm:$0xff] %vm636_vm3, %v633_v6 }
  0xf6 PF: > { %v642_v8 = vld [vmem:[%s2818_s8] sm:$0xff]  ;;  %v643_v9 = vld [vmem:[%s2818_s8 + $0x8] sm:$0xff]  ;;  %v644_v10 = vld [vmem:[%s2818_s8 + $0x10] sm:$0xff]  ;;  %v2674_v11 = vmov 0.0|0.0   ;;  %vm2675_vm4 = vmmov 0   ;;  %v2676_v14 = vmov 0.0  }
  0xf7   : > { %2403 = vmatprep.subr.bf16.mxu0 %v2674_v11  ;;  %v2404_v12 = vpack.c.bf16 %v643_v9, %v642_v8  ;;  %v645_v13 = vld [vmem:[%s2818_s8 + $0x18] sm:$0xff]  ;;  %2291 = vmatprep.mubr.msk.f32.mxu0 %vm2675_vm4, %v2676_v14  ;;  %vm740_vm5 = vcmask 285696   ;;  %s2677_s18 = smov 32   ;;  %vm646_vm6 = vcmask 261120   ;;  %s2678_s8 = smov 64   ;;  %vm727_vm7 = vcmask 281600  }
  0xf8   : > { %v720_v15 = vld [vmem:[#allocation3] sm:$0xff]  ;;  %741 = vst.msk [vmem:[#allocation7] sm:$0xff] %vm740_vm5, %v2676_v14  ;;  %v2407_v16 = vpack.c.bf16 %v645_v13, %v644_v10  ;;  %s2679_s20 = smov 96  }
  0xf9   : > { %722 = vrot.lane.b32.xlu0 %v720_v15, %s2677_s18  ;;  %2405 = vmatpush3.bf16.msra.mxu0 %v2404_v12 }
  0xfa   : > { %2406 = vmatprep.subr.bf16.mxu0 %v2674_v11 }
  0xfc   : > { %v641_v17 = vld [vmem:[#allocation2] sm:$0xff] }
  0xfd   : > { %2408 = vmatpush3.bf16.msra.mxu0 %v2407_v16 }
 0x100   : > { %2292 = vmatmul.mubr.msk.f32.vlgmr.msra.gmra.mrb[0].mxu0 %vm646_vm6, %v641_v17 }
 0x16b   : > { %v723_v18 = vpop.permute.xlu0 %722 }
 0x1d3   : > { %v716_v19 = vpop.f32.mrb[0].mxu0 }
 0x1d4   : > { %v725_v20 = vsel %vm646_vm6, %v716_v19, %v723_v18  ;;  %736 = vrot.lane.b32.xlu1 %v716_v19, %s2678_s8  ;;  %730 = vrot.lane.b32.xlu0 %v716_v19, %s2679_s20  ;;  %v2293_v21 = vpop.f32.mrb[1].mxu0 }
 0x1d5   : > { %v726_v22 = vpack.c.bf16 %v725_v20, %v725_v20 }
 0x1d7   : > { %728 = vst.msk [vmem:[#allocation4] sm:$0xf] %vm727_vm7, %v726_v22 }
 0x246   : > { %v737_v23 = vpop.permute.xlu1 %736  ;;  %v731_v24 = vpop.permute.xlu0 %730 }
 0x247   : > { %739 = vst.msk [vmem:[#allocation6] sm:$0xff] %vm646_vm6, %v737_v23  ;;  %v733_v25 = vsel %vm646_vm6, %v731_v24, %v723_v18 }
 0x248   : > { %v734_v26 = vpack.c.bf16 %v733_v25, %v733_v25 }
 0x24a   : > { %735 = vst.msk [vmem:[#allocation5] sm:$0xf] %vm727_vm7, %v734_v26 }
 0x24b PF: > { %v750_v27 = vld [vmem:[#allocation4] sm:$0xf]  ;;  %vm768_vm8 = vcmask 1043456   ;;  %v2853_v29 = vld [vmem:[%s2803_s23] sm:$0xff]   ;;  %vm761_vm9 = vcmask 64512   ;;  %v2859_v33 = vld [vmem:[%s2803_s23 + $0x8] sm:$0xff]  }
 0x24c   : > { %2459 = vmatprep.subr.msk.bf16.mxu0 %vm768_vm8, %v750_v27  ;;  %v770_v30 = vsel %vm768_vm8, %v750_v27, 0  ;;  %v2526_v32 = vld [vmem:[%s2808_s30] sm:$0xff]   ;;  %2296 = vmatprep.mubr.msk.bf16.mxu0 %vm761_vm9, %v2853_v29  ;;  %v2528_v34 = vld [vmem:[%s2808_s30 + $0x8] sm:$0xff]   ;;  %v990_v37 = vld [vmem:[%s2823_s21 + $0x10] sm:$0xff]  ;;  %vm992_vm10 = vcmask 261120   ;;  %vm914_vm11 = vcmask 23552  }
 0x24d   : > { %2295 = vmatpush3.bf16.msra.mxu0 %v770_v30  ;;  %2302 = vmatprep.mubr.msk.bf16.mxu1 %vm761_vm9, %v2526_v32  ;;  %v988_v35 = vld [vmem:[%s2823_s21] sm:$0xff]  ;;  %v989_v36 = vld [vmem:[%s2823_s21 + $0x8] sm:$0xff]  ;;  %v991_v39 = vld [vmem:[%s2823_s21 + $0x18] sm:$0xff]  ;;  %vm2683_vm12 = vmmov 0   ;;  %vm1705_vm5 = vcmask 285696   ;;  %p2200_p9 = scmp.ne.s32.totalorder %s2654_s25, 1 }
 0x24e   : > { %v2409_v38 = vpack.c.bf16 %v989_v36, %v988_v35  ;;  %v984_v40 = vld [vmem:[%s2813_s29] sm:$0xff]  ;;  %v2413_v41 = vpack.c.bf16 %v991_v39, %v990_v37  ;;  %v985_v42 = vld [vmem:[%s2813_s29 + $0x8] sm:$0xff]  ;;  %v986_v43 = vld [vmem:[%s2813_s29 + $0x10] sm:$0xff]  ;;  %vm2685_vm6 = vmmov (!%p2200_p9), 0   ;;  %s3104_s23 = sld [smem:[#allocation13_spill]] (!%p2200_p9)  ;;  %s2688_s24 = smov (!%p2200_p9), 96  }
 0x24f   : > { %v987_v44 = vld [vmem:[%s2813_s29 + $0x18] sm:$0xff]  ;;  %s2680_s29 = smov 96   ;;  %v1131_v13 = vld [vmem:[%s2823_s21 + $0x20] sm:$0xff]  ;;  %v1132_v14 = vld [vmem:[%s2823_s21 + $0x28] sm:$0xff]  ;;  %p2208_p10 = scmp.ne.s32.totalorder (!%p2200_p9), %s2658_s26, 1 }
 0x250   : > { %2297 = vmatmul.mubr.msk.bf16.vlgmr.msra.gmra.mrb[0].mxu0 %vm761_vm9, %v2859_v33  ;;  %2410 = vmatprep.subr.bf16.mxu0 %v2409_v38  ;;  %v2417_v15 = vpack.c.bf16 %v1132_v14, %v1131_v13  ;;  %v1133_v16 = vld [vmem:[%s2823_s21 + $0x30] sm:$0xff]  ;;  %v1134_v17 = vld [vmem:[%s2823_s21 + $0x38] sm:$0xff]  ;;  %v2155_v19 = vld [vmem:[%s2828_s19] ss:$0 sm:$0xff] }
 0x251   : > { %v821_v28 = vld [vmem:[#allocation5] sm:$0xf]  ;;  %2314 = vmatprep.mubr.msk.f32.mxu0 %vm992_vm10, %v984_v40  ;;  %2412 = vmatpush3.bf16.msra.mxu0 %v2409_v38  ;;  %v2421_v18 = vpack.c.bf16 %v1134_v17, %v1133_v16  ;;  %v2160_v25 = vld [vmem:[%s2828_s19 + $0x1] ss:$0 sm:$0xff] }
 0x252   : > { %2460 = vmatprep.subr.msk.bf16.mxu1 %vm768_vm8, %v821_v28  ;;  %v839_v31 = vsel %vm768_vm8, %v821_v28, 0  ;;  %2414 = vmatprep.subr.bf16.mxu0 %v2413_v41 }
 0x253   : > { %2301 = vmatpush3.bf16.msra.mxu1 %v839_v31 }
 0x254   : > { %2418 = vmatprep.subr.bf16.mxu1 %v2417_v15 }
 0x255   : > { %2416 = vmatpush3.bf16.msra.mxu0 %v2413_v41 }
 0x256   : > { %2303 = vmatmul.mubr.msk.bf16.vlgmr.msra.gmra.mrb[0].mxu1 %vm761_vm9, %v2528_v34 }
 0x257   : > { %2420 = vmatpush3.bf16.msra.mxu1 %v2417_v15 }
 0x258   : > { %2315 = vmatmul.mubr.msk.f32.vlgmr.msra.gmra.mrb[4].mxu0 %vm992_vm10, %v985_v42  ;;  %2422 = vmatprep.subr.bf16.mxu1 %v2421_v18 }
 0x259   : > { %2317 = vmatprep.mubr.msk.f32.mxu0 %vm992_vm10, %v986_v43 }
 0x25b   : > { %2424 = vmatpush3.bf16.msra.mxu1 %v2421_v18 }
 0x25c   : > { %2318 = vmatmul.mubr.msk.f32.gmra.mrb[6].mxu0 %vm992_vm10, %v987_v44 }
 0x323   : > { %v2298_v45 = vpop.f32.mrb[0].mxu0 }
 0x324   : > { %v806_v47 = vpop.f32.mrb[1].mxu0 }
 0x325   : > { %v2299_v51 = vpop.f32.mrb[2].mxu0 }
 0x326   : > { %v809_v55 = vpop.f32.mrb[3].mxu0 }
 0x329   : > { %v2304_v46 = vpop.f32.mrb[0].mxu1 }
 0x32a   : > { %v2878_v48 = vsub.f32 %v2298_v45, %v2304_v46  ;;  %v969_v49 = vadd.f32 %v2304_v46, %v2298_v45  ;;  %v875_v50 = vpop.f32.mrb[1].mxu1 }
 0x32b   : > { %v2880_v52 = vsub.f32 %v806_v47, %v875_v50  ;;  %v967_v53 = vadd.f32 %v875_v50, %v806_v47  ;;  %v2305_v54 = vpop.f32.mrb[2].mxu1  ;;  %v2316_v9 = vpop.f32.mrb[4].mxu0 }
 0x32c   : > { %v2882_v56 = vsub.f32 %v2299_v51, %v2305_v54  ;;  %v970_v57 = vadd.f32 %v2305_v54, %v2299_v51  ;;  %v878_v58 = vpop.f32.mrb[3].mxu1  ;;  %v896_v59 = vmul.f32 %v2878_v48, %v2878_v48  ;;  %v1071_v10 = vpop.f32.mrb[5].mxu0 }
 0x32d   : > { %v2886_v60 = vsub.f32 %v809_v55, %v878_v58  ;;  %v968_v61 = vadd.f32 %v878_v58, %v809_v55  ;;  %v894_v62 = vmul.f32 %v2880_v52, %v2880_v52 }
 0x32e   : > { %906 = vrot.lane.b32.xlu1 %v896_v59, %s2680_s29  ;;  %v897_v63 = vmul.f32 %v2882_v56, %v2882_v56 }
 0x32f   : > { %902 = vrot.lane.b32.xlu0 %v894_v62, %s2680_s29  ;;  %v895_v0 = vmul.f32 %v2886_v60, %v2886_v60  ;;  %v2319_v11 = vpop.f32.mrb[6].mxu0 }
 0x330   : > { %v1081_v12 = vpop.f32.mrb[7].mxu0 }
 0x332   : > { %908 = vrot.lane.b32.xlu1 %v897_v63, %s2680_s29 }
 0x333   : > { %904 = vrot.lane.b32.xlu0 %v895_v0, %s2680_s29 }
 0x3a0   : > { %v907_v1 = vpop.permute.xlu1 %906 }
 0x3a1   : > { %v903_v2 = vpop.permute.xlu0 %902  ;;  %v921_v5 = vsel %vm914_vm11, %v907_v1, 0.0 }
 0x3a2   : > { %v915_v3 = vsel %vm914_vm11, %v903_v2, 0.0 }
 0x3a3   : > { %916 = vadd.xlane.f32.xlu0 %v915_v3  ;;  %v1265_v3 = vld [vmem:[%s2823_s21 + $0x40] sm:$0xff] }
 0x3a4   : > { %v909_v7 = vpop.permute.xlu1 %908 }
 0x3a5   : > { %v905_v4 = vpop.permute.xlu0 %904  ;;  %v924_v8 = vsel %vm914_vm11, %v909_v7, 0.0  ;;  %v1268_v7 = vld [vmem:[%s2823_s21 + $0x58] sm:$0xff] }
 0x3a6   : > { %v918_v6 = vsel %vm914_vm11, %v905_v4, 0.0  ;;  %v1266_v4 = vld [vmem:[%s2823_s21 + $0x48] sm:$0xff] }
 0x3a7   : > { %922 = vadd.xlane.f32.xlu0 %v921_v5  ;;  %919 = vadd.xlane.f32.xlu1 %v918_v6  ;;  %v2425_v5 = vpack.c.bf16 %v1266_v4, %v1265_v3  ;;  %v1267_v6 = vld [vmem:[%s2823_s21 + $0x50] sm:$0xff] }
 0x3a9   : > { %2426 = vmatprep.subr.bf16.mxu0 %v2425_v5 }
 0x3aa   : > { %2428 = vmatpush3.bf16.msra.mxu0 %v2425_v5 }
 0x3ab   : > { %925 = vadd.xlane.f32.xlu0 %v924_v8  ;;  %v2429_v8 = vpack.c.bf16 %v1268_v7, %v1267_v6  ;;  %v2183_v6 = vld [vmem:[%s2828_s19 + $0x4] ss:$0 sm:$0xff] }
 0x3ad   : > { %2430 = vmatprep.subr.bf16.mxu0 %v2429_v8 }
 0x3ae   : > { %2432 = vmatpush3.bf16.msra.mxu0 %v2429_v8 }
 0x430   : > { %v2903_v20 = vpop.xlane.xlu0 %916 }
 0x431   : > { %v976_v21 = vmul.f32 %v2155_v19, %v2903_v20  ;;  %vm929_vm14 = vcmp.eq.f32.partialorder %v2903_v20, inf  ;;  %vm931_vm0 = vcmp.eq.f32.partialorder %v2903_v20, 0.0 }
 0x433   : > { %v980_v22 = vadd.f32 %v976_v21, %v967_v53 }
 0x434   : > { %v2906_v23 = vpop.xlane.xlu1 %919  ;;  %v2908_v24 = vpop.xlane.xlu0 %922 }
 0x435   : > { %v1090_v26 = vadd.f32 %v1071_v10, %v980_v22  ;;  %v977_v27 = vmul.f32 %v2155_v19, %v2906_v23  ;;  %v978_v28 = vmul.f32 %v2155_v19, %v2908_v24  ;;  %vm936_vm13 = vcmp.eq.f32.partialorder %v2906_v23, inf }
 0x436   : > { %vm938_vm15 = vcmp.eq.f32.partialorder %v2906_v23, 0.0  ;;  %vm943_vm2 = vcmp.eq.f32.partialorder %v2908_v24, inf  ;;  %vm945_vm4 = vcmp.eq.f32.partialorder %v2908_v24, 0.0 }
 0x437   : > { %v1099_v30 = vadd.f32 %v2160_v25, %v1090_v26  ;;  %v981_v31 = vadd.f32 %v977_v27, %v968_v61  ;;  %v982_v34 = vadd.f32 %v978_v28, %v969_v49 }
 0x438   : > { %v2913_v32 = vpop.xlane.xlu0 %925 }
 0x439   : > { %v2161_v35 = vmul.f32 -1.442695, %v1099_v30  ;;  %v1091_v36 = vadd.f32 %v2316_v9, %v981_v31  ;;  %v979_v37 = vmul.f32 %v2155_v19, %v2913_v32  ;;  %v1092_v38 = vadd.f32 %v1081_v12, %v982_v34  ;;  %v2165_v9 = vld [vmem:[%s2828_s19 + $0x2] ss:$0 sm:$0xff] }
 0x43a   : > { %vm950_vm1 = vcmp.eq.f32.partialorder %v2913_v32, inf  ;;  %vm952_vm3 = vcmp.eq.f32.partialorder %v2913_v32, 0.0 }
 0x43b   : > { %2529 = vpow2.f32 %v2161_v35  ;;  %v1100_v39 = vadd.f32 %v2160_v25, %v1091_v36  ;;  %v983_v40 = vadd.f32 %v979_v37, %v970_v57  ;;  %v1101_v41 = vadd.f32 %v2160_v25, %v1092_v38 }
 0x43d   : > { %v2162_v42 = vmul.f32 -1.442695, %v1100_v39  ;;  %v1093_v43 = vadd.f32 %v2319_v11, %v983_v40  ;;  %v2163_v44 = vmul.f32 -1.442695, %v1101_v41 }
 0x43f   : > { %2531 = vpow2.f32 %v2162_v42  ;;  %v1102_v45 = vadd.f32 %v2160_v25, %v1093_v43 }
 0x440   : > { %2533 = vpow2.f32 %v2163_v44  ;;  %v2174_v44 = vld [vmem:[%s2828_s19 + $0x3] ss:$0 sm:$0xff] }
 0x441   : > { %v2164_v46 = vmul.f32 -1.442695, %v1102_v45 }
 0x443   : > { %2535 = vpow2.f32 %v2164_v46 }
 0x445   : > { %v2530_v47 = vpop.eup %2529 }
 0x446   : > { %v1115_v50 = vadd.f32 1.0, %v2530_v47 }
 0x448   : > { %2537 = vrcp.f32 %v1115_v50 }
 0x449   : > { %v2532_v49 = vpop.eup %2531 }
 0x44a   : > { %v2534_v51 = vpop.eup %2533  ;;  %v1116_v53 = vadd.f32 1.0, %v2532_v49 }
 0x44b   : > { %v1117_v54 = vadd.f32 1.0, %v2534_v51 }
 0x44c   : > { %2539 = vrcp.f32 %v1116_v53 }
 0x44d   : > { %v2536_v55 = vpop.eup %2535  ;;  %2541 = vrcp.f32 %v1117_v54 }
 0x44e   : > { %v1118_v57 = vadd.f32 1.0, %v2536_v55 }
 0x450   : > { %2543 = vrcp.f32 %v1118_v57 }
 0x452   : > { %v2538_v58 = vpop.eup %2537 }
 0x453   : > { %v1127_v59 = vmul.f32 %v2538_v58, %v1099_v30 }
 0x455   : > { %2328 = vmatprep.mubr.msk.f32.mxu1 %vm992_vm10, %v1127_v59 }
 0x456   : > { %v2540_v61 = vpop.eup %2539 }
 0x457   : > { %v2542_v62 = vpop.eup %2541  ;;  %v1128_v63 = vmul.f32 %v2540_v61, %v1100_v39 }
 0x458   : > { %v1129_v0 = vmul.f32 %v2542_v62, %v1101_v41 }
 0x459   : > { %2329 = vmatmul.mubr.msk.f32.vlgmr.msra.gmra.mrb[4].mxu1 %vm992_vm10, %v1128_v63 }
 0x45a   : > { %v2544_v1 = vpop.eup %2543  ;;  %2331 = vmatprep.mubr.msk.f32.mxu1 %vm992_vm10, %v1129_v0 }
 0x45b   : > { %v1130_v2 = vmul.f32 %v2544_v1, %v1102_v45 }
 0x45d   : > { %2332 = vmatmul.mubr.msk.f32.gmra.mrb[6].mxu1 %vm992_vm10, %v1130_v2 }
 0x52c   : > { %v2330_v10 = vpop.f32.mrb[4].mxu1 }
 0x52d   : > { %v1224_v11 = vadd.f32 %v2330_v10, %v2165_v9  ;;  %v1218_v12 = vpop.f32.mrb[5].mxu1 }
 0x52e   : > { %v1219_v13 = vadd.f32 %v2165_v9, %v1218_v12 }
 0x52f   : > { %v2171_v14 = vmul.f32 -1.442695, %v1224_v11 }
 0x530   : > { %v2170_v15 = vmul.f32 -1.442695, %v1219_v13  ;;  %v2333_v16 = vpop.f32.mrb[6].mxu1 }
 0x531   : > { %2545 = vpow2.f32 %v2171_v14  ;;  %v1234_v17 = vadd.f32 %v2333_v16, %v2165_v9  ;;  %v1228_v18 = vpop.f32.mrb[7].mxu1 }
 0x532   : > { %2547 = vpow2.f32 %v2170_v15  ;;  %v1229_v19 = vadd.f32 %v2165_v9, %v1228_v18 }
 0x533   : > { %v2173_v21 = vmul.f32 -1.442695, %v1234_v17 }
 0x534   : > { %v2172_v22 = vmul.f32 -1.442695, %v1229_v19 }
 0x535   : > { %2549 = vpow2.f32 %v2173_v21 }
 0x536   : > { %2551 = vpow2.f32 %v2172_v22 }
 0x53b   : > { %v2546_v25 = vpop.eup %2545 }
 0x53c   : > { %v2548_v26 = vpop.eup %2547  ;;  %v1250_v27 = vadd.f32 1.0, %v2546_v25  ;;  %v2681_v25 = vmov 0  }
 0x53d   : > { %v1249_v28 = vadd.f32 1.0, %v2548_v26  ;;  %2523 = vset.pattern.permute.xlu0 %v2681_v25  ;;  %2524 = vset.pattern.permute.xlu1 %v2681_v25  ;;  %v1477_v26 = vld [vmem:[%s2823_s21 + $0x60] sm:$0xff] }
 0x53e   : > { %2553 = vrcp.f32 %v1250_v27  ;;  %v1478_v27 = vld [vmem:[%s2823_s21 + $0x68] sm:$0xff] }
 0x53f   : > { %v2550_v30 = vpop.eup %2549  ;;  %2555 = vrcp.f32 %v1249_v28  ;;  %v2433_v28 = vpack.c.bf16 %v1478_v27, %v1477_v26 }
 0x540   : > { %v2552_v31 = vpop.eup %2551  ;;  %v1252_v34 = vadd.f32 1.0, %v2550_v30  ;;  %v2184_v30 = vld [vmem:[%s2828_s19 + $0xb] ss:$0 sm:$0xff] }
 0x541   : > { %v1251_v35 = vadd.f32 1.0, %v2552_v31  ;;  %2434 = vmatprep.subr.bf16.mxu1 %v2433_v28 }
 0x542   : > { %2557 = vrcp.f32 %v1252_v34  ;;  %2436 = vmatpush3.bf16.msra.mxu1 %v2433_v28 }
 0x543   : > { %2559 = vrcp.f32 %v1251_v35 }
 0x548   : > { %v2554_v36 = vpop.eup %2553 }
 0x549   : > { %v2556_v37 = vpop.eup %2555  ;;  %v2927_v39 = vmul.f32 %v2554_v36, %v1224_v11 }
 0x54a   : > { %v2925_v38 = vmul.f32 %v2556_v37, %v1219_v13 }
 0x54c   : > { %v2558_v40 = vpop.eup %2557  ;;  %2342 = vmatprep.mubr.msk.f32.mxu0 %vm992_vm10, %v2925_v38 }
 0x54d   : > { %v2560_v41 = vpop.eup %2559  ;;  %2343 = vmatmul.mubr.msk.f32.vlgmr.msra.gmra.mrb[8].mxu0 %vm992_vm10, %v2927_v39  ;;  %v2935_v43 = vmul.f32 %v2558_v40, %v1234_v17 }
 0x54e   : > { %v2933_v42 = vmul.f32 %v2560_v41, %v1229_v19 }
 0x550   : > { %2345 = vmatprep.mubr.msk.f32.mxu0 %vm992_vm10, %v2933_v42 }
 0x551   : > { %2346 = vmatmul.mubr.msk.f32.gmra.mrb[10].mxu0 %vm992_vm10, %v2935_v43 }
 0x620   : > { %v2344_v45 = vpop.f32.mrb[8].mxu0 }
 0x621   : > { %v1358_v46 = vadd.f32 %v2344_v45, %v2174_v44  ;;  %v1352_v47 = vpop.f32.mrb[9].mxu0 }
 0x622   : > { %v1353_v50 = vadd.f32 %v2174_v44, %v1352_v47 }
 0x623   : > { %v2180_v49 = vmul.f32 -1.442695, %v1358_v46 }
 0x624   : > { %v2179_v51 = vmul.f32 -1.442695, %v1353_v50  ;;  %v2347_v53 = vpop.f32.mrb[10].mxu0 }
 0x625   : > { %2561 = vpow2.f32 %v2180_v49  ;;  %v1368_v54 = vadd.f32 %v2347_v53, %v2174_v44  ;;  %v1362_v55 = vpop.f32.mrb[11].mxu0 }
 0x626   : > { %2563 = vpow2.f32 %v2179_v51  ;;  %v1363_v57 = vadd.f32 %v2174_v44, %v1362_v55 }
 0x627   : > { %v2182_v58 = vmul.f32 -1.442695, %v1368_v54 }
 0x628   : > { %v2181_v59 = vmul.f32 -1.442695, %v1363_v57 }
 0x629   : > { %2565 = vpow2.f32 %v2182_v58 }
 0x62a   : > { %2567 = vpow2.f32 %v2181_v59 }
 0x62f   : > { %v2562_v61 = vpop.eup %2561 }
 0x630   : > { %v2564_v62 = vpop.eup %2563  ;;  %v1384_v63 = vadd.f32 1.0, %v2562_v61  ;;  %v1479_v61 = vld [vmem:[%s2823_s21 + $0x70] sm:$0xff] }
 0x631   : > { %v1383_v0 = vadd.f32 1.0, %v2564_v62  ;;  %v1480_v62 = vld [vmem:[%s2823_s21 + $0x78] sm:$0xff] }
 0x632   : > { %2569 = vrcp.f32 %v1384_v63 }
 0x633   : > { %v2566_v1 = vpop.eup %2565  ;;  %2571 = vrcp.f32 %v1383_v0  ;;  %v2437_v0 = vpack.c.bf16 %v1480_v62, %v1479_v61 }
 0x634   : > { %v2568_v2 = vpop.eup %2567  ;;  %v1386_v3 = vadd.f32 1.0, %v2566_v1 }
 0x635   : > { %v1385_v4 = vadd.f32 1.0, %v2568_v2  ;;  %2438 = vmatprep.subr.bf16.mxu1 %v2437_v0 }
 0x636   : > { %2573 = vrcp.f32 %v1386_v3  ;;  %2440 = vmatpush3.bf16.msra.mxu1 %v2437_v0 }
 0x637   : > { %2575 = vrcp.f32 %v1385_v4 }
 0x63c   : > { %v2570_v5 = vpop.eup %2569 }
 0x63d   : > { %v2572_v7 = vpop.eup %2571  ;;  %v1396_v8 = vmul.f32 %v2570_v5, %v1358_v46 }
 0x63e   : > { %v1395_v9 = vmul.f32 %v2572_v7, %v1353_v50 }
 0x63f   : > { %v1405_v10 = vmul.f32 %v2183_v6, %v1396_v8 }
 0x640   : > { %v2574_v11 = vpop.eup %2573  ;;  %v1404_v12 = vmul.f32 %v2183_v6, %v1395_v9 }
 0x641   : > { %v2576_v13 = vpop.eup %2575  ;;  %v1398_v14 = vmul.f32 %v2574_v11, %v1368_v54  ;;  %v1411_v15 = vsel %vm992_vm10, %v1405_v10, 0.0 }
 0x642   : > { %v1397_v16 = vmul.f32 %v2576_v13, %v1363_v57  ;;  %1412 = vadd.xlane.f32.xlu0 %v1411_v15  ;;  %v1408_v17 = vsel %vm992_vm10, %v1404_v12, 0.0 }
 0x643   : > { %1409 = vadd.xlane.f32.xlu1 %v1408_v17  ;;  %v1407_v18 = vmul.f32 %v2183_v6, %v1398_v14 }
 0x644   : > { %v1406_v19 = vmul.f32 %v2183_v6, %v1397_v16 }
 0x645   : > { %v1417_v21 = vsel %vm992_vm10, %v1407_v18, 0.0 }
 0x646   : > { %1418 = vadd.xlane.f32.xlu0 %v1417_v21  ;;  %v1414_v22 = vsel %vm992_vm10, %v1406_v19, 0.0 }
 0x647   : > { %1415 = vadd.xlane.f32.xlu1 %v1414_v22 }
 0x6cf   : > { %v1413_v31 = vpop.xlane.xlu0 %1412 }
 0x6d0   : > { %v1426_v34 = vadd.f32 %v2184_v30, %v1413_v31  ;;  %v1410_v35 = vpop.xlane.xlu1 %1409 }
 0x6d1   : > { %v1425_v36 = vadd.f32 %v2184_v30, %v1410_v35 }
 0x6d2   : > { %v2186_v37 = vmul.f32 -1.442695, %v1426_v34 }
 0x6d3   : > { %v2185_v40 = vmul.f32 -1.442695, %v1425_v36  ;;  %v1419_v41 = vpop.xlane.xlu0 %1418  ;;  %v2198_v36 = vld [vmem:[%s2828_s19 + $0x6] ss:$0 sm:$0xff] }
 0x6d4   : > { %2577 = vpow2.f32 %v2186_v37  ;;  %v1428_v44 = vadd.f32 %v2184_v30, %v1419_v41  ;;  %v1416_v45 = vpop.xlane.xlu1 %1415 }
 0x6d5   : > { %2579 = vpow2.f32 %v2185_v40  ;;  %v1427_v46 = vadd.f32 %v2184_v30, %v1416_v45 }
 0x6d6   : > { %v2188_v47 = vmul.f32 -1.442695, %v1428_v44 }
 0x6d7   : > { %v2187_v50 = vmul.f32 -1.442695, %v1427_v46 }
 0x6d8   : > { %2581 = vpow2.f32 %v2188_v47 }
 0x6d9   : > { %2583 = vpow2.f32 %v2187_v50 }
 0x6de   : > { %v2578_v49 = vpop.eup %2577 }
 0x6df   : > { %v2580_v51 = vpop.eup %2579  ;;  %v1442_v53 = vadd.f32 1.0, %v2578_v49 }
 0x6e0   : > { %v1441_v54 = vadd.f32 1.0, %v2580_v51 }
 0x6e1   : > { %2585 = vrcp.f32 %v1442_v53 }
 0x6e2   : > { %v2582_v55 = vpop.eup %2581  ;;  %2587 = vrcp.f32 %v1441_v54 }
 0x6e3   : > { %v2584_v57 = vpop.eup %2583  ;;  %v1444_v59 = vadd.f32 1.0, %v2582_v55 }
 0x6e4   : > { %v1443_v58 = vadd.f32 1.0, %v2584_v57 }
 0x6e6   : > { %2589 = vrcp.f32 %v1443_v58 }
 0x6e7   : > { %2591 = vrcp.f32 %v1444_v59  ;;  %v2682_v59 = vmov 0.0  }
 0x6e8   : > { %2362 = vmatprep.subr.bf16.mxu0 %v2682_v59  ;;  %2366 = vmatprep.mubr.msk.bf16.mxu0 %vm2683_vm12, %v2682_v59 }
 0x6eb   : > { %v2586_v63 = vpop.eup %2585 }
 0x6ec   : > { %v2588_v1 = vpop.eup %2587  ;;  %1460 = vperm.xlu0 %2523, %v2586_v63  }
 0x6ed   : > { %1455 = vperm.xlu1 %2524, %v2588_v1   ;;  %v939_v1 = vand.u32 2147483648, %v2906_v23 }
 0x6f0   : > { %v2590_v2 = vpop.eup %2589 }
 0x6f1   : > { %1465 = vperm.xlu1 %2524, %v2590_v2   ;;  %v2592_v3 = vpop.eup %2591 }
 0x6f5   : > { %1470 = vperm.xlu1 %2524, %v2592_v3   ;;  %v932_v3 = vand.u32 2147483648, %v2903_v20 }
 0x76b   : > { %v1461_v4 = vpop.permute.xlu0 %1460 }
 0x76c   : > { %v1456_v5 = vpop.permute.xlu1 %1455  ;;  %v2956_v7 = vmul.f32 %v1461_v4, %v2927_v39  ;;  %v2189_v39 = vld [vmem:[%s2828_s19 + $0x5] ss:$0 sm:$0xff] }
 0x76d   : > { %v2953_v6 = vmul.f32 %v1456_v5, %v2925_v38 }
 0x76f   : > { %2356 = vmatprep.mubr.msk.f32.mxu1 %vm992_vm10, %v2953_v6 }
 0x770   : > { %v1466_v8 = vpop.permute.xlu1 %1465  ;;  %2357 = vmatmul.mubr.msk.f32.vlgmr.msra.gmra.mrb[8].mxu1 %vm992_vm10, %v2956_v7 }
 0x771   : > { %v2963_v9 = vmul.f32 %v1466_v8, %v2933_v42 }
 0x773   : > { %2359 = vmatprep.mubr.msk.f32.mxu1 %vm992_vm10, %v2963_v9 }
 0x774   : > { %v1471_v10 = vpop.permute.xlu1 %1470 }
 0x775   : > { %v2968_v38 = vmul.f32 %v1471_v10, %v2935_v43 }
 0x777   : > { %2360 = vmatmul.mubr.msk.f32.gmra.mrb[10].mxu1 %vm992_vm10, %v2968_v38 }
 0x843   : > { %v2358_v11 = vpop.f32.mrb[8].mxu1 }
 0x844   : > { %v1570_v12 = vadd.f32 %v2358_v11, %v2189_v39  ;;  %v1564_v13 = vpop.f32.mrb[9].mxu1 }
 0x845   : > { %v1565_v14 = vadd.f32 %v2189_v39, %v1564_v13 }
 0x846   : > { %v2195_v15 = vmul.f32 -1.442695, %v1570_v12 }
 0x847   : > { %v2194_v16 = vmul.f32 -1.442695, %v1565_v14 }
 0x848   : > { %2593 = vpow2.f32 %v2195_v15 }
 0x849   : > { %2595 = vpow2.f32 %v2194_v16 }
 0x84a   : > { %v2361_v42 = vpop.f32.mrb[10].mxu1 }
 0x84b   : > { %v1580_v17 = vadd.f32 %v2361_v42, %v2189_v39  ;;  %v1574_v18 = vpop.f32.mrb[11].mxu1 }
 0x84c   : > { %v1575_v19 = vadd.f32 %v2189_v39, %v1574_v18 }
 0x84d   : > { %v2197_v21 = vmul.f32 -1.442695, %v1580_v17 }
 0x84e   : > { %v2196_v22 = vmul.f32 -1.442695, %v1575_v19 }
 0x84f   : > { %2597 = vpow2.f32 %v2197_v21 }
 0x850   : > { %2599 = vpow2.f32 %v2196_v22 }
 0x852   : > { %v2594_v43 = vpop.eup %2593 }
 0x853   : > { %v2596_v25 = vpop.eup %2595  ;;  %v1596_v26 = vadd.f32 1.0, %v2594_v43 }
 0x854   : > { %v1595_v27 = vadd.f32 1.0, %v2596_v25 }
 0x855   : > { %2601 = vrcp.f32 %v1596_v26 }
 0x856   : > { %2603 = vrcp.f32 %v1595_v27 }
 0x859   : > { %v2598_v28 = vpop.eup %2597 }
 0x85a   : > { %v2600_v30 = vpop.eup %2599  ;;  %v1598_v31 = vadd.f32 1.0, %v2598_v28 }
 0x85b   : > { %v1597_v34 = vadd.f32 1.0, %v2600_v30 }
 0x85c   : > { %2605 = vrcp.f32 %v1598_v31 }
 0x85d   : > { %2607 = vrcp.f32 %v1597_v34 }
 0x85e   : > { %2609 = vrsqrt.f32 %v2906_v23 }
 0x85f   : > { %v2602_v35 = vpop.eup %2601  ;;  %2611 = vrsqrt.f32 %v2903_v20 }
 0x860   : > { %v2604_v37 = vpop.eup %2603  ;;  %v1608_v40 = vmul.f32 %v2602_v35, %v1570_v12  ;;  %2613 = vrsqrt.f32 %v2913_v32 }
 0x861   : > { %v1607_v41 = vmul.f32 %v2604_v37, %v1565_v14  ;;  %2615 = vrsqrt.f32 %v2908_v24  ;;  %v953_v14 = vand.u32 2147483648, %v2913_v32 }
 0x862   : > { %v1617_v44 = vmul.f32 %v2198_v36, %v1608_v40 }
 0x863   : > { %v1616_v45 = vmul.f32 %v2198_v36, %v1607_v41 }
 0x864   : > { %v1623_v46 = vsel %vm992_vm10, %v1617_v44, 0.0  ;;  %v1642_v44 = vld [vmem:[#allocation7] sm:$0xff] }
 0x865   : > { %1624 = vadd.xlane.f32.xlu0 %v1623_v46  ;;  %v1620_v47 = vsel %vm992_vm10, %v1616_v45, 0.0 }
 0x866   : > { %v2606_v50 = vpop.eup %2605  ;;  %1621 = vadd.xlane.f32.xlu1 %v1620_v47 }
 0x867   : > { %v2608_v49 = vpop.eup %2607  ;;  %v1610_v51 = vmul.f32 %v2606_v50, %v1580_v17  ;;  %v1730_v50 = vld [vmem:[%s2823_s21 + $0x90] sm:$0xff] (!%p2200_p9) }
 0x868   : > { %v1609_v53 = vmul.f32 %v2608_v49, %v1575_v19  ;;  %v2610_v61 = vpop.eup %2609  ;;  %v2684_v49 = vmov (!%p2200_p9), 0.0|0.0  }
 0x869   : > { %v1619_v54 = vmul.f32 %v2198_v36, %v1610_v51  ;;  %v2612_v62 = vpop.eup %2611  ;;  %v935_v63 = vmul.f32 %v2610_v61, %v2906_v23  ;;  %2447 = vmatprep.subr.bf16.mxu1 (!%p2200_p9), %v2684_v49  ;;  %v1821_v61 = vld [vmem:[%s2823_s21 + $0xb0] sm:$0xff] (!%p2200_p9) }
 0x86a   : > { %v1618_v57 = vmul.f32 %v2198_v36, %v1609_v53  ;;  %v928_v0 = vmul.f32 %v2612_v62, %v2903_v20  ;;  %v2614_v2 = vpop.eup %2613  ;;  %v1731_v53 = vld [vmem:[%s2823_s21 + $0x98] sm:$0xff] (!%p2200_p9) }
 0x86b   : > { %v1629_v55 = vsel %vm992_vm10, %v1619_v54, 0.0  ;;  %v2616_v5 = vpop.eup %2615  ;;  %v949_v10 = vmul.f32 %v2614_v2, %v2913_v32  ;;  %v2686_v54 = vmov (!%p2200_p9), 0.0  }
 0x86c   : > { %1630 = vadd.xlane.f32.xlu1 %v1629_v55  ;;  %v1626_v58 = vsel %vm992_vm10, %v1618_v57, 0.0  ;;  %v942_v11 = vmul.f32 %v2616_v5, %v2908_v24  ;;  %2389 = vmatprep.mubr.msk.f32.mxu1 (!%p2200_p9), %vm2685_vm6, %v2686_v54  ;;  %v2445_v55 = vpack.c.bf16 (!%p2200_p9), %v1731_v53, %v1730_v50 }
 0x86d   : > { %v951_v13 = vsel %vm950_vm1, %v2913_v32, %v949_v10 }
 0x86e   : > { %v954_v15 = vsel %vm952_vm3, %v953_v14, %v951_v13  ;;  %v1712_v13 = vld [vmem:[#allocation2] sm:$0xff] (!%p2200_p9) }
 0x86f   : > { %v958_v42 = vadd.f32 1e-08, %v954_v15 }
 0x870   : > { %1627 = vadd.xlane.f32.xlu1 %v1626_v58  ;;  %v1819_v58 = vld [vmem:[%s2823_s21 + $0xa0] sm:$0xff] (!%p2200_p9) }
 0x89d   : > { %1645 = vxpose.xlu1.c.b16.start [1/2] (short) (narrow) %v2853_v29, 16  ;;  %v937_v29 = vsel %vm936_vm13, %v2906_v23, %v935_v63  ;;  %v946_v23 = vand.u32 2147483648, %v2908_v24  ;;  %v1822_v63 = vld [vmem:[%s2823_s21 + $0xb8] sm:$0xff] (!%p2200_p9) }
 0x89e   : > { %v940_v4 = vsel %vm938_vm15, %v939_v1, %v937_v29  ;;  %v1727_v29 = vld [vmem:[#allocation6] sm:$0xff] (!%p2200_p9)  ;;  %v2202_v1 = vld [vmem:[%s2828_s19 + $0x7] ss:$0 sm:$0xff] (!%p2200_p9) }
 0x89f   : > { %v956_v39 = vadd.f32 1e-08, %v940_v4 }
 0x8a1   : > { %1646 = vxpose.xlu1.c.b16.end [2/2] (short) (narrow) %v2859_v33, 16  ;;  %v930_v33 = vsel %vm929_vm14, %v2903_v20, %v928_v0  ;;  %2617 = vrcp.f32 %v956_v39  ;;  %v944_v20 = vsel %vm943_vm2, %v2908_v24, %v942_v11  ;;  %v2451_v0 = vpack.c.bf16 (!%p2200_p9), %v1822_v63, %v1821_v61 }
 0x8a2   : > { %v933_v8 = vsel %vm931_vm0, %v932_v3, %v930_v33  ;;  %v947_v16 = vsel %vm945_vm4, %v946_v23, %v944_v20  ;;  %v2205_v20 = vld [vmem:[%s2828_s19 + $0x8] ss:$0 sm:$0xff] (!%p2200_p9) }
 0x8a3   : > { %v955_v12 = vadd.f32 1e-08, %v933_v8  ;;  %v957_v17 = vadd.f32 1e-08, %v947_v16 }
 0x8a5   : > { %2619 = vrcp.f32 %v955_v12  ;;  %v2687_v12 = vmov (!%p2200_p9), 0  }
 0x8a6   : > { %2621 = vrcp.f32 %v958_v42  ;;  %2625 = vset.pattern.permute.xlu0 (!%p2200_p9), %v2687_v12 }
 0x8a7   : > { %2623 = vrcp.f32 %v957_v17  ;;  %v1714_v17 = vld [vmem:[%s3104_s23] sm:$0xff] (!%p2200_p9) }
 0x8ab   : > { %v2618_v18 = vpop.eup %2617 }
 0x8ac   : > { %v964_v21 = vmul.f32 %v2618_v18, %v2886_v60 }
 0x8af   : > { %v2620_v19 = vpop.eup %2619 }
 0x8b0   : > { %v963_v43 = vmul.f32 %v2620_v19, %v2880_v52  ;;  %v2622_v28 = vpop.eup %2621 }
 0x8b1   : > { %v2624_v31 = vpop.eup %2623  ;;  %v966_v35 = vmul.f32 %v2622_v28, %v2882_v56 }
 0x8b2   : > { %v965_v52 = vmul.f32 %v2624_v31, %v2878_v48 }
 0x8f2   : > { %v1625_v22 = vpop.xlane.xlu0 %1624 }
 0x8f3   : > { %v1633_v25 = vmul.f32 %v1625_v22, %v964_v21  ;;  %v1622_v32 = vpop.xlane.xlu1 %1621 }
 0x8f4   : > { %v1632_v26 = vmul.f32 %v1622_v32, %v963_v43 }
 0x8f5   : > { %v1637_v27 = vsel %vm992_vm10, %v2956_v7, %v1633_v25 }
 0x8f6   : > { %v1636_v24 = vsel %vm992_vm10, %v2953_v6, %v1632_v26 }
 0x8f7   : > { %v1640_v30 = vpack.c.bf16 %v1637_v27, %v1636_v24  ;;  %v1713_v24 = vld [vmem:[#allocation3] sm:$0xff] (!%p2200_p9) }
 0x8f9   : > { %2363 = vmatpush3.bf16.msra.mxu0 %v1640_v30  ;;  %v1631_v34 = vpop.xlane.xlu1 %1630 }
 0x8fa   : > { %2364 = vmatprep.subr.bf16.mxu0 %v2682_v59  ;;  %v1635_v60 = vmul.f32 %v1631_v34, %v966_v35  ;;  %v1820_v59 = vld [vmem:[%s2823_s21 + $0xa8] sm:$0xff] (!%p2200_p9) }
 0x8fb   : > { %v2448_v62 = vpack.c.bf16 (!%p2200_p9), %v1820_v59, %v1819_v58  ;;  %v2206_v35 = vld [vmem:[%s2828_s19 + $0x9] ss:$0 sm:$0xff] (!%p2200_p9) }
 0x8fc   : > { %v1639_v40 = vsel %vm992_vm10, %v2968_v38, %v1635_v60  ;;  %v1729_v38 = vld [vmem:[%s2823_s21 + $0x88] sm:$0xff] (!%p2200_p9) }
 0x8fd   : > { %v1628_v36 = vpop.xlane.xlu1 %1627  ;;  %2449 = vmatpush3.bf16.msra.mxu1 (!%p2200_p9), %v2448_v62 }
 0x8fe   : > { %v1634_v37 = vmul.f32 %v1628_v36, %v965_v52  ;;  %2450 = vmatprep.subr.bf16.mxu1 (!%p2200_p9), %v2684_v49  ;;  %v2207_v52 = vld [vmem:[%s2828_s19 + $0xa] ss:$0 sm:$0xff] (!%p2200_p9) }
 0x900   : > { %v1638_v7 = vsel %vm992_vm10, %v2963_v9, %v1634_v37  ;;  %v1728_v9 = vld [vmem:[%s2823_s21 + $0x80] sm:$0xff] (!%p2200_p9) }
 0x901   : > { %v1641_v6 = vpack.c.bf16 %v1639_v40, %v1638_v7  ;;  %v2442_v51 = vpack.c.bf16 (!%p2200_p9), %v1729_v38, %v1728_v9  ;;  %2452 = vmatpush3.bf16.msra.mxu1 (!%p2200_p9), %v2451_v0 }
 0x903   : > { %2365 = vmatpush3.bf16.msra.mxu0 %v1641_v6  ;;  %v1653_v41 = vpop.trf.xlu1 }
 0x904   : > { %2441 = vmatprep.subr.bf16.mxu0 (!%p2200_p9), %v2684_v49 }
 0x906   : > { %2367 = vmatmul.mubr.msk.bf16.vlgmr.msra.gmra.mrb[12].mxu0 %vm992_vm10, %v1653_v41 }
 0x907   : > { %2378 = vmatprep.mubr.msk.f32.mxu0 (!%p2200_p9), %vm2685_vm6, %v2686_v54  ;;  %2443 = vmatpush3.bf16.msra.mxu0 (!%p2200_p9), %v2442_v51 }
 0x908   : > { %2444 = vmatprep.subr.bf16.mxu0 (!%p2200_p9), %v2684_v49 }
 0x90b   : > { %2446 = vmatpush3.bf16.msra.mxu0 (!%p2200_p9), %v2445_v55 }
 0x9d6   : > { %1710 = sbr.rel (%p2200_p9) target bundleno = 3530 (0xdca), region = 84 }
 0x9d9   : > { %v1698_v45 = vpop.f32.mrb[12].mxu0 }
 0x9da   : > { %v1704_v56 = vadd.f32 %v1698_v45, %v1642_v44  ;;  %v2368_v46 = vpop.f32.mrb[13].mxu0 }
 0x9db   : > { %v1701_v47 = vpop.f32.mrb[14].mxu0 }
 0x9dc   : > { %1706 = vst.msk [vmem:[#allocation7] sm:$0xff] %vm1705_vm5, %v1704_v56  ;;  %v2369_v48 = vpop.f32.mrb[15].mxu0 }
 0x9dd   : > { %s3105_s22 = sld [smem:[#allocation15_spill]] (!%p2208_p10)  ;;  %v2689_v41 = vmov (!%p2208_p10), 0.0|0.0   ;;  %vm2690_vm7 = vmmov (!%p2208_p10), 0   ;;  %v2691_v56 = vmov (!%p2208_p10), 0.0   ;;  %s2692_s26 = smov (!%p2208_p10), 8   ;;  %vm2025_vm8 = vcmask (!%p2208_p10), 89088  }
 0x9de   : > { %2453 = vmatprep.subr.bf16.mxu0 (!%p2208_p10), %v2689_v41  ;;  %s3106_s16 = sld [smem:[#allocation16_spill]] (!%p2208_p10)  ;;  %s3107_s8 = sld [smem:[#allocation17_spill]] (!%p2208_p10) }
 0x9e3   : > { %v1711_v57 = vld [vmem:[#allocation7] sm:$0xff]  ;;  %v1936_v7 = vld [vmem:[%s3105_s22 + $0x8] sm:$0xff] (!%p2208_p10)  ;;  %v1937_v6 = vld [vmem:[%s3105_s22 + $0x10] sm:$0xff] (!%p2208_p10) }
 0x9e4   : > { %2379 = vmatmul.mubr.msk.f32.vlgmr.msra.gmra.mrb[0].mxu0 %vm992_vm10, %v1711_v57  ;;  %v1935_v40 = vld [vmem:[%s3105_s22] sm:$0xff] (!%p2208_p10)  ;;  %v1938_v45 = vld [vmem:[%s3105_s22 + $0x18] sm:$0xff] (!%p2208_p10) }
 0x9e5   : > { %v2454_v44 = vpack.c.bf16 (!%p2208_p10), %v1936_v7, %v1935_v40  ;;  %2400 = vmatprep.mubr.msk.f32.mxu0 (!%p2208_p10), %vm2690_vm7, %v2691_v56  ;;  %v2457_v47 = vpack.c.bf16 (!%p2208_p10), %v1938_v45, %v1937_v6  ;;  %v2209_v9 = vld [vmem:[%s3106_s16] ss:$0 sm:$0xff] (!%p2208_p10) }
 0x9e7   : > { %2455 = vmatpush3.bf16.msra.mxu0 (!%p2208_p10), %v2454_v44 }
 0x9e8   : > { %2456 = vmatprep.subr.bf16.mxu0 (!%p2208_p10), %v2689_v41 }
 0x9eb   : > { %2458 = vmatpush3.bf16.msra.mxu0 (!%p2208_p10), %v2457_v47 }
 0xab7   : > { %v1801_v33 = vpop.f32.mrb[0].mxu0 }
 0xab8   : > { %v1805_v2 = vadd.f32 %v1801_v33, %v1727_v29  ;;  %v2380_v3 = vpop.f32.mrb[1].mxu0 }
 0xaba   : > { %v1811_v4 = vadd.f32 %v2202_v1, %v1805_v2 }
 0xabc   : > { %v2203_v5 = vmul.f32 -1.442695, %v1811_v4 }
 0xabe   : > { %2626 = vpow2.f32 %v2203_v5 }
 0xac8   : > { %v2627_v8 = vpop.eup %2626 }
 0xac9   : > { %v1815_v10 = vadd.f32 1.0, %v2627_v8 }
 0xacb   : > { %2628 = vrcp.f32 %v1815_v10 }
 0xad5   : > { %v2629_v39 = vpop.eup %2628 }
 0xad6   : > { %v1818_v11 = vmul.f32 %v2629_v39, %v1811_v4 }
 0xad8   : > { %2390 = vmatmul.mubr.msk.f32.vlgmr.msra.gmra.mrb[0].mxu1 %vm992_vm10, %v1818_v11 }
 0xbab   : > { %v1892_v14 = vpop.f32.mrb[0].mxu1 }
 0xbac   : > { %v1896_v23 = vadd.f32 %v1892_v14, %v1712_v13  ;;  %v2391_v15 = vpop.f32.mrb[1].mxu1 }
 0xbae   : > { %v1902_v16 = vadd.f32 %v2205_v20, %v1896_v23 }
 0xbb0   : > { %v1903_v42 = vsel %vm992_vm10, %v1902_v16, 0.0 }
 0xbb1   : > { %1904 = vadd.xlane.f32.xlu0 %v1903_v42 }
 0xbc7   : > { %1717 = vperm.xlu0 %2625, %v1714_v17  }
 0xc3e   : > { %v1905_v18 = vpop.xlane.xlu0 %1904 }
 0xc3f   : > { %v1907_v19 = vmul.f32 0.03125, %v1905_v18 }
 0xc41   : > { %v1908_v21 = vsub.f32 %v1902_v16, %v1907_v19 }
 0xc43   : > { %v1909_v22 = vmul.f32 %v1908_v21, %v1908_v21 }
 0xc45   : > { %v1910_v43 = vsel %vm992_vm10, %v1909_v22, 0.0 }
 0xc46   : > { %1911 = vadd.xlane.f32.xlu1 %v1910_v43  ;;  %v1718_v25 = vpop.permute.xlu0 %1717 }
 0xc47   : > { %v1720_v32 = vmul.f32 %v1718_v25, %v1711_v57 }
 0xc57   : > { %1722 = vrot.lane.b32.xlu1 %v1720_v32, %s2688_s24 }
 0xcd3   : > { %v1912_v26 = vpop.xlane.xlu1 %1911 }
 0xcd4   : > { %v1913_v27 = vmul.f32 0.03125, %v1912_v26 }
 0xcd6   : > { %v1914_v28 = vadd.f32 1e-05, %v1913_v27 }
 0xcd7   : > { %v1723_v30 = vpop.permute.xlu1 %1722 }
 0xcd8   : > { %2630 = vrsqrt.f32 %v1914_v28  ;;  %v1725_v31 = vadd.f32 %v1723_v30, %v1713_v24 }
 0xcda   : > { %1726 = vst.msk [vmem:[#allocation3] sm:$0xff] %vm914_vm11, %v1725_v31 }
 0xce1   : > { %v2019_v46 = vld [vmem:[#allocation3] sm:$0xff] (!%p2208_p10) }
 0xce2   : > { %v2631_v34 = vpop.eup %2630  ;;  %2021 = vrot.lane.b32.xlu0 (!%p2208_p10), %v2019_v46, %s2692_s26 }
 0xce3   : > { %v1916_v60 = vmul.f32 %v2631_v34, %v1908_v21  ;;  %1933 = sbr.rel (%p2208_p10) target bundleno = 3530 (0xdca), region = 88 }
 0xce5   : > { %v1922_v36 = vmul.f32 %v2206_v35, %v1916_v60 }
 0xce7   : > { %v1928_v37 = vadd.f32 %v2207_v52, %v1922_v36 }
 0xce9   : > { %1929 = vst.msk [vmem:[#allocation2] sm:$0xff] %vm992_vm10, %v1928_v37 }
 0xcf0   : > { %v1934_v48 = vld [vmem:[#allocation2] sm:$0xff] }
 0xcf1   : > { %2401 = vmatmul.mubr.msk.f32.vlgmr.msra.gmra.mrb[0].mxu0 %vm992_vm10, %v1934_v48 }
 0xd54   : > { %v2022_v50 = vpop.permute.xlu0 %2021 }
 0xdc4   : > { %v2015_v38 = vpop.f32.mrb[0].mxu0 }
 0xdc5   : > { %v2016_v49 = vadd.f32 %v2209_v9, %v2015_v38  ;;  %v2402_v51 = vpop.f32.mrb[1].mxu0 }
 0xdc7   : > { %v2024_v53 = vsel %vm761_vm9, %v2016_v49, %v2022_v50 }
 0xdc8   : > { %v2026_v54 = vsel %vm2025_vm8, %v2024_v53, 0.0 }
 0xdc9   : > { %2027 = vst [vmem:[%s3107_s8] sm:$0xff] %v2026_v54 }
 0xdca PF: > { %s3108_s20 = sld [smem:[#allocation10_spill]]  ;;  %s3109_s25 = sld [smem:[#allocation8_spill]] }
 0xdcb   : > { %s3110_s26 = sld [smem:[#allocation9_spill]]  ;;  %s3111_s27 = sld [smem:[#allocation11_spill]] }
 0xdcc   : > { %s3112_s28 = sld [smem:[#allocation12_spill]] }
 0xdd0   : > { %s23_s29 = sadd.s32 1, %s3108_s20  }
 0xdd1   : > { %p20_p11 = scmp.ge.s32.totalorder %s23_s29, 6  }
 0xdd3   :  { %22 = sbr.rel (!%p20_p11) target bundleno = 6 (0x6), region = 129 }

</bundles_post_ra>
